<compile_context>
chip_gen: v7x
topology: tpu7x:2x2x1
jax: 0.10.0
libtpu: 0.0.40
codegen_flags: <defaults>
</compile_context>

<pallas_src>
import jax
import jax.numpy as jnp
from jax.experimental import pallas as pl
from jax.experimental.pallas import tpu as pltpu

HID = 512    # hidden dim 400 padded to 512 (whole vregs, full MXU tiles)
LAT = 128    # fused encoder head [mu|logvar] 40 padded to 128 lanes
OUT = 896    # decoder output 784 padded to 896 = 7 * 128 lanes
IN = 784     # flattened MNIST input (28*28), block covers full dim
ZDIM = 20    # latent size


def _round_up(n, m):
    return ((n + m - 1) // m) * m


def vae_kernel(x_ref, eps_ref,
               w1_ref, b1_ref, wenc_ref, benc_ref,
               w3_ref, b3_ref, w4_ref, b4_ref,
               recon_ref, mulv_ref):
    # encode: h1 = relu(fc1(x));  x arrives as bf16 (cast once in the wrapper)
    h1 = jnp.dot(x_ref[...], w1_ref[...],
                 preferred_element_type=jnp.float32) + b1_ref[...]
    h1 = jnp.maximum(h1, 0.0)

    # fused fc21 || fc22, padded to 128 lanes: (TB, 128) = [mu(20)|logvar(20)|0...]
    mulv = jnp.dot(h1.astype(jnp.bfloat16), wenc_ref[...],
                   preferred_element_type=jnp.float32) + benc_ref[...]
    mu = mulv[:, :ZDIM]
    logvar = mulv[:, ZDIM:2 * ZDIM]

    # reparameterize (training path): z = eps * exp(0.5*logvar) + mu
    z = eps_ref[...] * jnp.exp(0.5 * logvar) + mu

    # decode: h3 = relu(fc3(z)); recon = sigmoid(fc4(h3))
    h3 = jnp.dot(z.astype(jnp.bfloat16), w3_ref[...],
                 preferred_element_type=jnp.float32) + b3_ref[...]
    h3 = jnp.maximum(h3, 0.0)
    logits = jnp.dot(h3.astype(jnp.bfloat16), w4_ref[...],
                     preferred_element_type=jnp.float32) + b4_ref[...]
    # sigmoid: exp on EUP, approx reciprocal also on EUP (keeps divide off VALU);
    # clamp so downstream log(1-recon) never sees a value epsilon above 1.
    recon = jnp.minimum(pl.reciprocal(1.0 + jnp.exp(-logits), approx=True), 1.0)

    recon_ref[...] = recon.astype(recon_ref.dtype)
    mulv_ref[...] = mulv


def vae_forward(x_nchw, params, eps, *, batch_tile=512):
    """x_nchw: (B,1,28,28) f32. Returns (recon (B,784), mu (B,20), logvar (B,20))."""
    B = x_nchw.shape[0]
    # matches torch x.view(-1, 784); bf16 halves the x DMA stream
    x_flat = x_nchw.reshape(B, IN).astype(jnp.bfloat16)
    eps = eps.astype(jnp.float32)

    (w1, b1, w21, b21, w22, b22, w3, b3, w4, b4) = params

    # Zero-padded, bf16, VMEM-resident weights (f32 accumulation in-kernel).
    w1p = jnp.pad(w1, ((0, 0), (0, HID - 400))).astype(jnp.bfloat16)     # (784, 512)
    b1p = jnp.pad(b1, ((0, 0), (0, HID - 400)))                          # (1, 512)
    wenc = jnp.concatenate([w21, w22], axis=1)                           # (400, 40)
    wencp = jnp.pad(wenc, ((0, HID - 400), (0, LAT - 40))).astype(jnp.bfloat16)  # (512, 128)
    bencp = jnp.pad(jnp.concatenate([b21, b22], axis=1), ((0, 0), (0, LAT - 40)))
    w3p = jnp.pad(w3, ((0, 0), (0, HID - 400))).astype(jnp.bfloat16)     # (20, 512)
    b3p = jnp.pad(b3, ((0, 0), (0, HID - 400)))                          # (1, 512)
    w4p = jnp.pad(w4, ((0, HID - 400), (0, OUT - 784))).astype(jnp.bfloat16)     # (512, 896)
    b4p = jnp.pad(b4, ((0, 0), (0, OUT - 784)))                          # (1, 896)

    # Batch tile: single step for small B; otherwise keep >= 2 grid steps so the
    # "parallel" batch axis can use both v7x TensorCores.  16-row alignment keeps
    # bf16 (16,128) sublane tiling happy.
    if B <= 256:
        TB = _round_up(B, 16)
    else:
        TB = min(batch_tile, _round_up((B + 1) // 2, 16))
    Bp = _round_up(B, TB)
    if Bp != B:
        x_flat = jnp.pad(x_flat, ((0, Bp - B), (0, 0)))
        eps = jnp.pad(eps, ((0, Bp - B), (0, 0)))
    grid = (Bp // TB,)

    batched = lambda feat: pl.BlockSpec((TB, feat), lambda i: (i, 0))
    resident = lambda shape: pl.BlockSpec(shape, lambda i: (0, 0))

    recon, mulv = pl.pallas_call(
        vae_kernel,
        out_shape=(
            jax.ShapeDtypeStruct((Bp, OUT), jnp.bfloat16),   # padded recon (lane-dense)
            jax.ShapeDtypeStruct((Bp, LAT), jnp.float32),    # [mu | logvar | 0...]
        ),
        grid=grid,
        in_specs=[
            batched(IN),             # x (bf16)
            batched(ZDIM),           # eps (f32)
            resident((IN, HID)),     # w1  (bf16)
            resident((1, HID)),      # b1
            resident((HID, LAT)),    # wenc = fc21 || fc22 (bf16)
            resident((1, LAT)),      # benc
            resident((ZDIM, HID)),   # w3  (bf16)
            resident((1, HID)),      # b3
            resident((HID, OUT)),    # w4  (bf16)
            resident((1, OUT)),      # b4
        ],
        out_specs=(batched(OUT), batched(LAT)),
        compiler_params=pltpu.CompilerParams(
            dimension_semantics=("parallel",),
            vmem_limit_bytes=32 * 1024 * 1024,
        ),
    )(x_flat, eps, w1p, b1p, wencp, bencp, w3p, b3p, w4p, b4p)

    recon = recon[:B, :784].astype(jnp.float32)
    mu = mulv[:B, :ZDIM]
    logvar = mulv[:B, ZDIM:2 * ZDIM]
    return recon, mu, logvar


def init_params(key):
    """Deterministic Linear params. Weights stored as (in, out); biases as (1, out)."""
    dims = [
        ("fc1", 784, 400),
        ("fc21", 400, 20),
        ("fc22", 400, 20),
        ("fc3", 20, 400),
        ("fc4", 400, 784),
    ]
    params = []
    for i, (_, fan_in, fan_out) in enumerate(dims):
        kw, kb = jax.random.split(jax.random.fold_in(key, i))
        bound = 1.0 / jnp.sqrt(fan_in)
        w = jax.random.uniform(kw, (fan_in, fan_out), jnp.float32, -bound, bound)
        b = jax.random.uniform(kb, (1, fan_out), jnp.float32, -bound, bound)
        params.append(w)
        params.append(b)
    return tuple(params)


def vae_ref(x_nchw, params, eps):
    """Pure-JAX f32 reference for correctness checking."""
    (w1, b1, w21, b21, w22, b22, w3, b3, w4, b4) = params
    x = x_nchw.reshape(x_nchw.shape[0], 784)
    h1 = jnp.maximum(x @ w1 + b1, 0.0)
    mu = h1 @ w21 + b21
    logvar = h1 @ w22 + b22
    z = eps * jnp.exp(0.5 * logvar) + mu
    h3 = jnp.maximum(z @ w3 + b3, 0.0)
    recon = jax.nn.sigmoid(h3 @ w4 + b4)
    return recon, mu, logvar


if __name__ == "__main__":
    key = jax.random.PRNGKey(0)
    k_x, k_eps, k_p = jax.random.split(key, 3)

    B = 2
    x = jax.random.uniform(k_x, (B, 1, 28, 28), jnp.float32)   # MNIST-like NCHW input
    eps = jax.random.normal(k_eps, (B, 20), jnp.float32)       # reparameterization noise
    params = init_params(k_p)

    recon, mu, logvar = jax.block_until_ready(vae_forward(x, params, eps))

    r_ref, m_ref, lv_ref = vae_ref(x, params, eps)
    assert recon.shape == (B, 784) and mu.shape == (B, 20) and logvar.shape == (B, 20)
    # bf16 weights/activations I/O + approx reciprocal -> relaxed tolerance
    # (all matmul accumulation is still f32).
    assert jnp.allclose(recon, r_ref, atol=3e-2, rtol=3e-2)
    assert jnp.allclose(mu, m_ref, atol=3e-2, rtol=3e-2)
    assert jnp.allclose(logvar, lv_ref, atol=3e-2, rtol=3e-2)

    print("KERNEL_OK")
</pallas_src>

<mosaic_0001>
module attributes {stable_mosaic.version = 11 : i64} {
  func.func @vae_kernel(%arg0: i32, %arg1: memref<16x784xbf16, #tpu.memory_space<vmem>>, %arg2: memref<16x20xf32, #tpu.memory_space<vmem>>, %arg3: memref<784x512xbf16, #tpu.memory_space<vmem>>, %arg4: memref<1x512xf32, #tpu.memory_space<vmem>>, %arg5: memref<512x128xbf16, #tpu.memory_space<vmem>>, %arg6: memref<1x128xf32, #tpu.memory_space<vmem>>, %arg7: memref<20x512xbf16, #tpu.memory_space<vmem>>, %arg8: memref<1x512xf32, #tpu.memory_space<vmem>>, %arg9: memref<512x896xbf16, #tpu.memory_space<vmem>>, %arg10: memref<1x896xf32, #tpu.memory_space<vmem>>, %arg11: memref<16x896xbf16, #tpu.memory_space<vmem>>, %arg12: memref<16x128xf32, #tpu.memory_space<vmem>>) attributes {dimension_semantics = [#tpu.dimension_semantics<parallel>], iteration_bounds = array<i64: 1>, scalar_prefetch = 0 : i64, scratch_operands = 0 : i64, tpu.core_type = #tpu.core_type<tc>, window_params = [{transform_indices = @transform_0, window_bounds = array<i64: 16, 784>}, {transform_indices = @transform_1, window_bounds = array<i64: 16, 20>}, {pipeline_mode = #tpu.pipeline_mode<synchronous>, transform_indices = @transform_2, window_bounds = array<i64: 784, 512>}, {pipeline_mode = #tpu.pipeline_mode<synchronous>, transform_indices = @transform_3, window_bounds = array<i64: 1, 512>}, {pipeline_mode = #tpu.pipeline_mode<synchronous>, transform_indices = @transform_4, window_bounds = array<i64: 512, 128>}, {pipeline_mode = #tpu.pipeline_mode<synchronous>, transform_indices = @transform_5, window_bounds = array<i64: 1, 128>}, {pipeline_mode = #tpu.pipeline_mode<synchronous>, transform_indices = @transform_6, window_bounds = array<i64: 20, 512>}, {pipeline_mode = #tpu.pipeline_mode<synchronous>, transform_indices = @transform_7, window_bounds = array<i64: 1, 512>}, {pipeline_mode = #tpu.pipeline_mode<synchronous>, transform_indices = @transform_8, window_bounds = array<i64: 512, 896>}, {pipeline_mode = #tpu.pipeline_mode<synchronous>, transform_indices = @transform_9, window_bounds = array<i64: 1, 896>}, {transform_indices = @transform_10, window_bounds = array<i64: 16, 896>}, {transform_indices = @transform_11, window_bounds = array<i64: 16, 128>}]} {
    %c0 = arith.constant 0 : index
    %c0_0 = arith.constant 0 : index
    %0 = vector.load %arg1[%c0, %c0_0] : memref<16x784xbf16, #tpu.memory_space<vmem>>, vector<16x784xbf16>
    %c0_1 = arith.constant 0 : index
    %c0_2 = arith.constant 0 : index
    %1 = vector.load %arg3[%c0_1, %c0_2] : memref<784x512xbf16, #tpu.memory_space<vmem>>, vector<784x512xbf16>
    %cst = arith.constant dense<0.000000e+00> : vector<16x512xf32>
    %2 = tpu.matmul %0, %1, %cst {dimension_numbers = #tpu.dot_dimension_numbers<[1], [0], [0], [1], [0, 0, 1, 1], [], []>} : vector<16x784xbf16>, vector<784x512xbf16>, vector<16x512xf32> -> vector<16x512xf32>
    %c0_3 = arith.constant 0 : index
    %c0_4 = arith.constant 0 : index
    %3 = vector.load %arg4[%c0_3, %c0_4] : memref<1x512xf32, #tpu.memory_space<vmem>>, vector<1x512xf32>
    %4 = vector.broadcast %3 : vector<1x512xf32> to vector<16x512xf32>
    %5 = arith.addf %2, %4 : vector<16x512xf32>
    %cst_5 = arith.constant 0.000000e+00 : f32
    %6 = vector.broadcast %cst_5 : f32 to vector<16x512xf32>
    %7 = arith.maximumf %5, %6 : vector<16x512xf32>
    %8 = arith.truncf %7 : vector<16x512xf32> to vector<16x512xbf16>
    %c0_6 = arith.constant 0 : index
    %c0_7 = arith.constant 0 : index
    %9 = vector.load %arg5[%c0_6, %c0_7] : memref<512x128xbf16, #tpu.memory_space<vmem>>, vector<512x128xbf16>
    %cst_8 = arith.constant dense<0.000000e+00> : vector<16x128xf32>
    %10 = tpu.matmul %8, %9, %cst_8 {dimension_numbers = #tpu.dot_dimension_numbers<[1], [0], [0], [1], [0, 0, 1, 1], [], []>} : vector<16x512xbf16>, vector<512x128xbf16>, vector<16x128xf32> -> vector<16x128xf32>
    %c0_9 = arith.constant 0 : index
    %c0_10 = arith.constant 0 : index
    %11 = vector.load %arg6[%c0_9, %c0_10] : memref<1x128xf32, #tpu.memory_space<vmem>>, vector<1x128xf32>
    %12 = vector.broadcast %11 : vector<1x128xf32> to vector<16x128xf32>
    %13 = arith.addf %10, %12 : vector<16x128xf32>
    %14 = vector.extract_strided_slice %13 {offsets = [0, 0], sizes = [16, 20], strides = [1, 1]} : vector<16x128xf32> to vector<16x20xf32>
    %15 = vector.extract_strided_slice %13 {offsets = [0, 20], sizes = [16, 20], strides = [1, 1]} : vector<16x128xf32> to vector<16x20xf32>
    %c0_11 = arith.constant 0 : index
    %c0_12 = arith.constant 0 : index
    %16 = vector.load %arg2[%c0_11, %c0_12] : memref<16x20xf32, #tpu.memory_space<vmem>>, vector<16x20xf32>
    %cst_13 = arith.constant 5.000000e-01 : f32
    %17 = vector.broadcast %cst_13 : f32 to vector<16x20xf32>
    %18 = arith.mulf %17, %15 : vector<16x20xf32>
    %19 = math.exp %18 : vector<16x20xf32>
    %20 = arith.mulf %16, %19 : vector<16x20xf32>
    %21 = arith.addf %20, %14 : vector<16x20xf32>
    %22 = arith.truncf %21 : vector<16x20xf32> to vector<16x20xbf16>
    %c0_14 = arith.constant 0 : index
    %c0_15 = arith.constant 0 : index
    %23 = vector.load %arg7[%c0_14, %c0_15] : memref<20x512xbf16, #tpu.memory_space<vmem>>, vector<20x512xbf16>
    %cst_16 = arith.constant dense<0.000000e+00> : vector<16x512xf32>
    %24 = tpu.matmul %22, %23, %cst_16 {dimension_numbers = #tpu.dot_dimension_numbers<[1], [0], [0], [1], [0, 0, 1, 1], [], []>} : vector<16x20xbf16>, vector<20x512xbf16>, vector<16x512xf32> -> vector<16x512xf32>
    %c0_17 = arith.constant 0 : index
    %c0_18 = arith.constant 0 : index
    %25 = vector.load %arg8[%c0_17, %c0_18] : memref<1x512xf32, #tpu.memory_space<vmem>>, vector<1x512xf32>
    %26 = vector.broadcast %25 : vector<1x512xf32> to vector<16x512xf32>
    %27 = arith.addf %24, %26 : vector<16x512xf32>
    %cst_19 = arith.constant 0.000000e+00 : f32
    %28 = vector.broadcast %cst_19 : f32 to vector<16x512xf32>
    %29 = arith.maximumf %27, %28 : vector<16x512xf32>
    %30 = arith.truncf %29 : vector<16x512xf32> to vector<16x512xbf16>
    %c0_20 = arith.constant 0 : index
    %c0_21 = arith.constant 0 : index
    %31 = vector.load %arg9[%c0_20, %c0_21] : memref<512x896xbf16, #tpu.memory_space<vmem>>, vector<512x896xbf16>
    %cst_22 = arith.constant dense<0.000000e+00> : vector<16x896xf32>
    %32 = tpu.matmul %30, %31, %cst_22 {dimension_numbers = #tpu.dot_dimension_numbers<[1], [0], [0], [1], [0, 0, 1, 1], [], []>} : vector<16x512xbf16>, vector<512x896xbf16>, vector<16x896xf32> -> vector<16x896xf32>
    %c0_23 = arith.constant 0 : index
    %c0_24 = arith.constant 0 : index
    %33 = vector.load %arg10[%c0_23, %c0_24] : memref<1x896xf32, #tpu.memory_space<vmem>>, vector<1x896xf32>
    %34 = vector.broadcast %33 : vector<1x896xf32> to vector<16x896xf32>
    %35 = arith.addf %32, %34 : vector<16x896xf32>
    %cst_25 = arith.constant 0.000000e+00 : f32
    %36 = vector.broadcast %cst_25 : f32 to vector<16x896xf32>
    %37 = arith.subf %36, %35 : vector<16x896xf32>
    %38 = math.exp %37 : vector<16x896xf32>
    %cst_26 = arith.constant 1.000000e+00 : f32
    %39 = vector.broadcast %cst_26 : f32 to vector<16x896xf32>
    %40 = arith.addf %39, %38 : vector<16x896xf32>
    %41 = tpu.reciprocal %40 {approx = true} : vector<16x896xf32> -> vector<16x896xf32>
    %cst_27 = arith.constant 1.000000e+00 : f32
    %42 = vector.broadcast %cst_27 : f32 to vector<16x896xf32>
    %43 = arith.minimumf %41, %42 : vector<16x896xf32>
    %44 = arith.truncf %43 : vector<16x896xf32> to vector<16x896xbf16>
    %c0_28 = arith.constant 0 : index
    %c0_29 = arith.constant 0 : index
    %45 = vector.load %arg11[%c0_28, %c0_29] : memref<16x896xbf16, #tpu.memory_space<vmem>>, vector<16x896xbf16>
    tpu.vector_store %arg11[%c0_28, %c0_29], %44 {strides = array<i32>} : memref<16x896xbf16, #tpu.memory_space<vmem>>, vector<16x896xbf16>,
    %c0_30 = arith.constant 0 : index
    %c0_31 = arith.constant 0 : index
    %46 = vector.load %arg12[%c0_30, %c0_31] : memref<16x128xf32, #tpu.memory_space<vmem>>, vector<16x128xf32>
    tpu.vector_store %arg12[%c0_30, %c0_31], %13 {strides = array<i32>} : memref<16x128xf32, #tpu.memory_space<vmem>>, vector<16x128xf32>,
    return
  }
  func.func @transform_0(%arg0: i32) -> (i32, i32) {
    %c0_i32 = arith.constant 0 : i32
    %c0_i32_0 = arith.constant 0 : i32
    return %arg0, %c0_i32 : i32, i32
  }
  func.func @transform_1(%arg0: i32) -> (i32, i32) {
    %c0_i32 = arith.constant 0 : i32
    %c0_i32_0 = arith.constant 0 : i32
    return %arg0, %c0_i32 : i32, i32
  }
  func.func @transform_2(%arg0: i32) -> (i32, i32) {
    %c0_i32 = arith.constant 0 : i32
    %c0_i32_0 = arith.constant 0 : i32
    %c0_i32_1 = arith.constant 0 : i32
    return %c0_i32, %c0_i32_0 : i32, i32
  }
  func.func @transform_3(%arg0: i32) -> (i32, i32) {
    %c0_i32 = arith.constant 0 : i32
    %c0_i32_0 = arith.constant 0 : i32
    %c0_i32_1 = arith.constant 0 : i32
    return %c0_i32, %c0_i32_0 : i32, i32
  }
  func.func @transform_4(%arg0: i32) -> (i32, i32) {
    %c0_i32 = arith.constant 0 : i32
    %c0_i32_0 = arith.constant 0 : i32
    %c0_i32_1 = arith.constant 0 : i32
    return %c0_i32, %c0_i32_0 : i32, i32
  }
  func.func @transform_5(%arg0: i32) -> (i32, i32) {
    %c0_i32 = arith.constant 0 : i32
    %c0_i32_0 = arith.constant 0 : i32
    %c0_i32_1 = arith.constant 0 : i32
    return %c0_i32, %c0_i32_0 : i32, i32
  }
  func.func @transform_6(%arg0: i32) -> (i32, i32) {
    %c0_i32 = arith.constant 0 : i32
    %c0_i32_0 = arith.constant 0 : i32
    %c0_i32_1 = arith.constant 0 : i32
    return %c0_i32, %c0_i32_0 : i32, i32
  }
  func.func @transform_7(%arg0: i32) -> (i32, i32) {
    %c0_i32 = arith.constant 0 : i32
    %c0_i32_0 = arith.constant 0 : i32
    %c0_i32_1 = arith.constant 0 : i32
    return %c0_i32, %c0_i32_0 : i32, i32
  }
  func.func @transform_8(%arg0: i32) -> (i32, i32) {
    %c0_i32 = arith.constant 0 : i32
    %c0_i32_0 = arith.constant 0 : i32
    %c0_i32_1 = arith.constant 0 : i32
    return %c0_i32, %c0_i32_0 : i32, i32
  }
  func.func @transform_9(%arg0: i32) -> (i32, i32) {
    %c0_i32 = arith.constant 0 : i32
    %c0_i32_0 = arith.constant 0 : i32
    %c0_i32_1 = arith.constant 0 : i32
    return %c0_i32, %c0_i32_0 : i32, i32
  }
  func.func @transform_10(%arg0: i32) -> (i32, i32) {
    %c0_i32 = arith.constant 0 : i32
    %c0_i32_0 = arith.constant 0 : i32
    return %arg0, %c0_i32 : i32, i32
  }
  func.func @transform_11(%arg0: i32) -> (i32, i32) {
    %c0_i32 = arith.constant 0 : i32
    %c0_i32_0 = arith.constant 0 : i32
    return %arg0, %c0_i32 : i32, i32
  }
}

</mosaic_0001>

<bundles_post_ra>
// kernel: tpu_custom_call.1
= control target key start
LH: loop header
LB: loop body
LE: loop exit
PB: predicated region body
PF: predicated region fallthrough
CT: control target
= control target key end

     0   :  { %17 = vsyncpa [#allocation3], 0  ;;  %s6061_s0 = inlined_call_operand.hbm [shape: bf16[16,784], index: 0, kind: input, shape index: {}]   ;;  %s6062_s1 = inlined_call_operand.hbm [shape: f32[16,20], index: 1, kind: input, shape index: {}]   ;;  %s6063_s2 = inlined_call_operand.hbm [shape: bf16[784,512], index: 2, kind: input, shape index: {}]   ;;  %s6064_s3 = inlined_call_operand.vmem [shape: f32[1,512], index: 3, kind: input, shape index: {}]   ;;  %s6065_s4 = inlined_call_operand.hbm [shape: bf16[512,128], index: 4, kind: input, shape index: {}]   ;;  %s6066_s5 = inlined_call_operand.vmem [shape: f32[1,128], index: 5, kind: input, shape index: {}]   ;;  %s6067_s6 = inlined_call_operand.hbm [shape: bf16[20,512], index: 6, kind: input, shape index: {}]   ;;  %s6068_s7 = inlined_call_operand.vmem [shape: f32[1,512], index: 7, kind: input, shape index: {}]   ;;  %s6069_s8 = inlined_call_operand.hbm [shape: bf16[512,896], index: 8, kind: input, shape index: {}]   ;;  %s6070_s9 = inlined_call_operand.vmem [shape: f32[1,896], index: 9, kind: input, shape index: {}]   ;;  %s6071_s10 = inlined_call_operand.hbm [shape: bf16[16,896], index: 10, kind: output, shape index: {0}]   ;;  %s6072_s11 = inlined_call_operand.hbm [shape: f32[16,128], index: 11, kind: output, shape index: {1}]  }
   0x1   :  { %18 = vsyncpa [#allocation6], 0 }
   0x2   :  { %19 = vsyncpa [#allocation9], 0 }
   0x3   :  { %20 = vsyncpa [#allocation12], 0 }
   0x4   :  { %21 = vsyncpa [#allocation4], 0 }
   0x5   :  { %22 = vsyncpa [#allocation15], 0  ;;  %s5787_s17 = smov [#allocation5]   ;;  %s5599_s21 = scalar_lea.hbm %s6062_s1, 256 }
   0x6   :  { %s40_s18 = sshll.u32 %s5787_s17, 4  ;;  %p5600_p0 = scmp.ne.s32.totalorder %s6062_s1, %s5599_s21  ;;  %s41_s18 = int_to_ptr.vmem [resolvable:$true] %s40_s18 }
   0x7   :  { %p5603_p1 = scmp.lt.u32.totalorder %s5599_s21, %s6062_s1 }
   0x9   :  { %p5605_p2 = pnand %p5603_p1, %p5600_p0 }
   0xb   :  { %5608 = shalt.err (!%p5605_p2)
}
   0xc   :  { %s5609_s26 = scalar_lea.vmem %s41_s18, 256  ;;  %p5614_p4 = scmp.lt.s32.totalorder %s41_s18, %s41_s18 }
   0xd   :  { %p5610_p3 = scmp.ne.s32.totalorder %s41_s18, %s5609_s26  ;;  %p5615_p5 = scmp.lt.s32.totalorder %s5609_s26, %s5609_s26 }
   0xf   :  { %p5616_p6 = por %p5615_p5, %p5614_p4 }
  0x11   :  { %p5617_p7 = pnand %p5616_p6, %p5610_p3 }
  0x13   :  { %5620 = shalt.err (!%p5617_p7)
}
  0x14   :  { %s5788_s27 = smov 128   ;;  %s5789_s28 = smov 8  }
  0x15   :  { %46 = dma.hbm_to_vmem [thread:$0]  %s6062_s1, 256, %s41_s18, [#allocation6], %s5788_s27, %s5788_s27, %s5789_s28  }
  0x16   :  { %s5790_s12 = smov [#allocation8]   ;;  %s5621_s16 = scalar_lea.hbm %s6065_s4, 4096 }
  0x17   :  { %s66_s13 = sshll.u32 %s5790_s12, 4  ;;  %p5622_p8 = scmp.ne.s32.totalorder %s6065_s4, %s5621_s16  ;;  %s67_s13 = int_to_ptr.vmem [resolvable:$true] %s66_s13 }
  0x18   :  { %p5625_p9 = scmp.lt.u32.totalorder %s5621_s16, %s6065_s4 }
  0x1a   :  { %p5627_p10 = pnand %p5625_p9, %p5622_p8 }
  0x1c   :  { %5630 = shalt.err (!%p5627_p10)
}
  0x1d   :  { %s5631_s22 = scalar_lea.vmem %s67_s13, 4096  ;;  %p5636_p12 = scmp.lt.s32.totalorder %s67_s13, %s67_s13 }
  0x1e   :  { %p5632_p11 = scmp.ne.s32.totalorder %s67_s13, %s5631_s22  ;;  %p5637_p13 = scmp.lt.s32.totalorder %s5631_s22, %s5631_s22 }
  0x20   :  { %p5638_p0 = por %p5637_p13, %p5636_p12 }
  0x22   :  { %p5639_p1 = pnand %p5638_p0, %p5632_p11 }
  0x24   :  { %5642 = shalt.err (!%p5639_p1)
}
  0x25   :  { %s5791_s1 = smov 64   ;;  %s5792_s18 = smov 4  }
  0x26   :  { %72 = dma.hbm_to_vmem [thread:$0]  %s6065_s4, 4096, %s67_s13, [#allocation9], %s5791_s1, %s5791_s1, %s5792_s18  }
  0x27   :  { %s5793_s25 = smov [#allocation2]   ;;  %s5643_s12 = scalar_lea.hbm %s6061_s0, 896 }
  0x28   :  { %s28_s26 = sshll.u32 %s5793_s25, 4  ;;  %p5644_p2 = scmp.ne.s32.totalorder %s6061_s0, %s5643_s12  ;;  %s29_s26 = int_to_ptr.vmem [resolvable:$true] %s28_s26 }
  0x29   :  { %p5647_p3 = scmp.lt.u32.totalorder %s5643_s12, %s6061_s0 }
  0x2b   :  { %p5649_p4 = pnand %p5647_p3, %p5644_p2 }
  0x2d   :  { %5652 = shalt.err (!%p5649_p4)
}
  0x2e   :  { %s5653_s19 = scalar_lea.vmem %s29_s26, 896  ;;  %p5658_p6 = scmp.lt.s32.totalorder %s29_s26, %s29_s26 }
  0x2f   :  { %p5654_p5 = scmp.ne.s32.totalorder %s29_s26, %s5653_s19  ;;  %p5659_p7 = scmp.lt.s32.totalorder %s5653_s19, %s5653_s19 }
  0x31   :  { %p5660_p8 = por %p5659_p7, %p5658_p6 }
  0x33   :  { %p5661_p9 = pnand %p5660_p8, %p5654_p5 }
  0x35   :  { %5664 = shalt.err (!%p5661_p9)
}
  0x36   :  { %s5794_s4 = smov 448   ;;  %s5795_s13 = smov 28  }
  0x37   :  { %34 = dma.hbm_to_vmem [thread:$0]  %s6061_s0, 896, %s29_s26, [#allocation3], %s5794_s4, %s5794_s4, %s5795_s13  }
  0x38   :  { %s5796_s22 = smov [#allocation7]   ;;  %s5665_s24 = scalar_lea.hbm %s6063_s2, 25088 }
  0x39   :  { %s52_s1 = sshll.u32 %s5796_s22, 4  ;;  %p5666_p10 = scmp.ne.s32.totalorder %s6063_s2, %s5665_s24  ;;  %s53_s1 = int_to_ptr.vmem [resolvable:$true] %s52_s1 }
  0x3a   :  { %p5669_p11 = scmp.lt.u32.totalorder %s5665_s24, %s6063_s2 }
  0x3c   :  { %p5671_p12 = pnand %p5669_p11, %p5666_p10 }
  0x3e   :  { %5674 = shalt.err (!%p5671_p12)
}
  0x3f   :  { %s5675_s14 = scalar_lea.vmem %s53_s1, 25088  ;;  %p5680_p0 = scmp.lt.s32.totalorder %s53_s1, %s53_s1 }
  0x40   :  { %p5676_p13 = scmp.ne.s32.totalorder %s53_s1, %s5675_s14  ;;  %p5681_p1 = scmp.lt.s32.totalorder %s5675_s14, %s5675_s14 }
  0x42   :  { %p5682_p2 = por %p5681_p1, %p5680_p0 }
  0x44   :  { %p5683_p3 = pnand %p5682_p2, %p5676_p13 }
  0x46   :  { %5686 = shalt.err (!%p5683_p3)
}
  0x47   :  { %s5797_s0 = smov 256   ;;  %s5798_s26 = smov 16  }
  0x48   :  { %58 = dma.hbm_to_vmem [thread:$0]  %s6063_s2, 25088, %s53_s1, [#allocation6], %s5797_s0, %s5797_s0, %s5798_s26  }
  0x49   :  { %s5799_s17 = smov [#allocation10]   ;;  %s5800_s20 = smov [#allocation11]  }
  0x4a   :  { %s80_s19 = sshll.u32 %s5799_s17, 4  ;;  %s94_s21 = sshll.u32 %s5800_s20, 4  ;;  %s81_s19 = int_to_ptr.vmem [resolvable:$true] %s80_s19  ;;  %s5919_s21 = int_to_ptr.vmem [resolvable:$true] %s94_s21 }
  0x4b   :  { %s5687_s23 = scalar_lea.hbm %s6067_s6, 768 }
  0x4c   :  { %p5688_p4 = scmp.ne.s32.totalorder %s6067_s6, %s5687_s23  ;;  %p5691_p5 = scmp.lt.u32.totalorder %s5687_s23, %s6067_s6 }
  0x4e   :  { %p5693_p6 = pnand %p5691_p5, %p5688_p4 }
  0x50   :  { %5696 = shalt.err (!%p5693_p6)
}
  0x51   :  { %s5697_s2 = scalar_lea.vmem %s81_s19, 768  ;;  %p5702_p8 = scmp.lt.s32.totalorder %s81_s19, %s81_s19 }
  0x52   :  { %p5698_p7 = scmp.ne.s32.totalorder %s81_s19, %s5697_s2  ;;  %p5703_p9 = scmp.lt.s32.totalorder %s5697_s2, %s5697_s2 }
  0x54   :  { %p5704_p10 = por %p5703_p9, %p5702_p8 }
  0x56   :  { %p5705_p11 = pnand %p5704_p10, %p5698_p7 }
  0x58   :  { %5708 = shalt.err (!%p5705_p11)
}
  0x59   :  { %86 = dma.hbm_to_vmem [thread:$0]  %s6067_s6, 768, %s81_s19, [#allocation9], %s5797_s0, %s5797_s0, %s5798_s26  }
  0x5a   :  { %s5709_s16 = scalar_lea.hbm %s6069_s8, 28672 }
  0x5b   :  { %p5710_p12 = scmp.ne.s32.totalorder %s6069_s8, %s5709_s16  ;;  %p5713_p13 = scmp.lt.u32.totalorder %s5709_s16, %s6069_s8 }
  0x5d   :  { %p5715_p0 = pnand %p5713_p13, %p5710_p12 }
  0x5f   :  { %5718 = shalt.err (!%p5715_p0)
}
  0x60   :  { %s5719_s23 = scalar_lea.vmem %s5919_s21, 28672  ;;  %p5724_p2 = scmp.lt.s32.totalorder %s5919_s21, %s5919_s21 }
  0x61   :  { %p5720_p1 = scmp.ne.s32.totalorder %s5919_s21, %s5719_s23  ;;  %p5725_p3 = scmp.lt.s32.totalorder %s5719_s23, %s5719_s23 }
  0x63   :  { %p5726_p4 = por %p5725_p3, %p5724_p2 }
  0x65   :  { %p5727_p5 = pnand %p5726_p4, %p5720_p1 }
  0x67   :  { %5730 = shalt.err (!%p5727_p5)
}
  0x68   :  { %100 = dma.hbm_to_vmem [thread:$0]  %s6069_s8, 28672, %s5919_s21, [#allocation12], %s5794_s4, %s5794_s4, %s5795_s13  }
  0x69   :  { %5775 = dma.done.wait [#allocation3], 896  }
  0x6a   :  { %5776 = vsyncadd [#allocation3], 4294966400 }
  0x6b   :  { %5777 = dma.done.wait [#allocation6], 25344  }
  0x6c   :  { %5778 = vsyncadd [#allocation6], 4294941952 }
  0x6d   :  { %5779 = dma.done.wait [#allocation9], 4864  }
  0x6e   :  { %5780 = vsyncadd [#allocation9], 4294962432 }
  0x6f   :  { %5781 = dma.done.wait [#allocation12], 28672  }
  0x70   :  { %5782 = vsyncadd [#allocation12], 4294938624  ;;  %v4873_v0 = vld [vmem:[#allocation7 + $0x4] ss:$16 sps:$4 sm:$0xff]   ;;  %v4875_v1 = vld [vmem:[#allocation7 + $0xc] ss:$16 sps:$4 sm:$0xff]  }
  0x71   :  { %1367 = vmatprep.subr.bf16.mxu0 %v4873_v0  ;;  %v4877_v2 = vld [vmem:[#allocation7] ss:$16 sps:$4 sm:$0xff]   ;;  %v4878_v3 = vld [vmem:[#allocation7 + $0x8] ss:$16 sps:$4 sm:$0xff]   ;;  %1539 = vmatprep.subr.bf16.mxu1 %v4875_v1  ;;  %v4879_v4 = vld [vmem:[#allocation7 + $0x24] ss:$16 sps:$4 sm:$0xff]  }
  0x72   :  { %1368 = vmatpush1.bf16.msra.mxu0 %v4877_v2  ;;  %1540 = vmatpush1.bf16.msra.mxu1 %v4878_v3  ;;  %v4881_v5 = vld [vmem:[#allocation7 + $0x2c] ss:$16 sps:$4 sm:$0xff]   ;;  %v4883_v6 = vld [vmem:[#allocation7 + $0x20] ss:$16 sps:$4 sm:$0xff]   ;;  %v4884_v7 = vld [vmem:[#allocation7 + $0x28] ss:$16 sps:$4 sm:$0xff]  }
  0x73   :  { %1369 = vmatprep.subr.bf16.mxu0 %v4879_v4  ;;  %1541 = vmatprep.subr.bf16.mxu1 %v4881_v5  ;;  %v4885_v8 = vld [vmem:[#allocation7 + $0x44] ss:$16 sps:$4 sm:$0xff]   ;;  %v4887_v9 = vld [vmem:[#allocation7 + $0x4c] ss:$16 sps:$4 sm:$0xff]   ;;  %v4889_v10 = vld [vmem:[#allocation7 + $0x40] ss:$16 sps:$4 sm:$0xff]  }
  0x74   :  { %v4890_v11 = vld [vmem:[#allocation7 + $0x48] ss:$16 sps:$4 sm:$0xff]   ;;  %v4891_v12 = vld [vmem:[#allocation7 + $0x64] ss:$16 sps:$4 sm:$0xff]   ;;  %v4893_v13 = vld [vmem:[#allocation7 + $0x6c] ss:$16 sps:$4 sm:$0xff]  }
  0x75   :  { %v4895_v14 = vld [vmem:[#allocation7 + $0x60] ss:$16 sps:$4 sm:$0xff]   ;;  %v4896_v15 = vld [vmem:[#allocation7 + $0x68] ss:$16 sps:$4 sm:$0xff]   ;;  %v4897_v16 = vld [vmem:[#allocation7 + $0x84] ss:$16 sps:$4 sm:$0xff]  }
  0x76   :  { %1370 = vmatpush1.bf16.msra.mxu0 %v4883_v6  ;;  %1542 = vmatpush1.bf16.msra.mxu1 %v4884_v7  ;;  %v4899_v17 = vld [vmem:[#allocation7 + $0x8c] ss:$16 sps:$4 sm:$0xff]   ;;  %v4901_v18 = vld [vmem:[#allocation7 + $0x80] ss:$16 sps:$4 sm:$0xff]   ;;  %v4902_v19 = vld [vmem:[#allocation7 + $0x88] ss:$16 sps:$4 sm:$0xff]  }
  0x77   :  { %1371 = vmatprep.subr.bf16.mxu0 %v4885_v8  ;;  %1543 = vmatprep.subr.bf16.mxu1 %v4887_v9  ;;  %v4903_v20 = vld [vmem:[#allocation7 + $0xa4] ss:$16 sps:$4 sm:$0xff]   ;;  %v4905_v21 = vld [vmem:[#allocation7 + $0xac] ss:$16 sps:$4 sm:$0xff]   ;;  %v4907_v22 = vld [vmem:[#allocation7 + $0xa0] ss:$16 sps:$4 sm:$0xff]  }
  0x78   :  { %v4908_v23 = vld [vmem:[#allocation7 + $0xa8] ss:$16 sps:$4 sm:$0xff]   ;;  %v4909_v24 = vld [vmem:[#allocation7 + $0xc4] ss:$16 sps:$4 sm:$0xff]   ;;  %v4911_v25 = vld [vmem:[#allocation7 + $0xcc] ss:$16 sps:$4 sm:$0xff]  }
  0x79   :  { %v4913_v26 = vld [vmem:[#allocation7 + $0xc0] ss:$16 sps:$4 sm:$0xff]   ;;  %v4914_v27 = vld [vmem:[#allocation7 + $0xc8] ss:$16 sps:$4 sm:$0xff]   ;;  %v4915_v28 = vld [vmem:[#allocation7 + $0xe4] ss:$16 sps:$4 sm:$0xff]  }
  0x7a   :  { %1372 = vmatpush1.bf16.msra.mxu0 %v4889_v10  ;;  %1544 = vmatpush1.bf16.msra.mxu1 %v4890_v11  ;;  %v4917_v29 = vld [vmem:[#allocation7 + $0xec] ss:$16 sps:$4 sm:$0xff]   ;;  %v4919_v30 = vld [vmem:[#allocation7 + $0xe0] ss:$16 sps:$4 sm:$0xff]   ;;  %v4920_v31 = vld [vmem:[#allocation7 + $0xe8] ss:$16 sps:$4 sm:$0xff]  }
  0x7b   :  { %1373 = vmatprep.subr.bf16.mxu0 %v4891_v12  ;;  %1545 = vmatprep.subr.bf16.mxu1 %v4893_v13  ;;  %v4921_v32 = vld [vmem:[#allocation7 + $0x104] ss:$16 sps:$4 sm:$0xff]   ;;  %v4923_v33 = vld [vmem:[#allocation7 + $0x10c] ss:$16 sps:$4 sm:$0xff]   ;;  %v4925_v34 = vld [vmem:[#allocation7 + $0x100] ss:$16 sps:$4 sm:$0xff]  }
  0x7c   :  { %v4926_v35 = vld [vmem:[#allocation7 + $0x108] ss:$16 sps:$4 sm:$0xff]   ;;  %v4927_v36 = vld [vmem:[#allocation7 + $0x124] ss:$16 sps:$4 sm:$0xff]   ;;  %v4929_v37 = vld [vmem:[#allocation7 + $0x12c] ss:$16 sps:$4 sm:$0xff]  }
  0x7d   :  { %v4931_v38 = vld [vmem:[#allocation7 + $0x120] ss:$16 sps:$4 sm:$0xff]   ;;  %v4932_v39 = vld [vmem:[#allocation7 + $0x128] ss:$16 sps:$4 sm:$0xff]   ;;  %v4933_v40 = vld [vmem:[#allocation7 + $0x144] ss:$16 sps:$4 sm:$0xff]  }
  0x7e   :  { %1374 = vmatpush1.bf16.msra.mxu0 %v4895_v14  ;;  %1546 = vmatpush1.bf16.msra.mxu1 %v4896_v15  ;;  %v4935_v41 = vld [vmem:[#allocation7 + $0x14c] ss:$16 sps:$4 sm:$0xff]   ;;  %v4937_v42 = vld [vmem:[#allocation7 + $0x140] ss:$16 sps:$4 sm:$0xff]   ;;  %v4938_v43 = vld [vmem:[#allocation7 + $0x148] ss:$16 sps:$4 sm:$0xff]  }
  0x7f   :  { %1375 = vmatprep.subr.bf16.mxu0 %v4897_v16  ;;  %1547 = vmatprep.subr.bf16.mxu1 %v4899_v17  ;;  %v4939_v44 = vld [vmem:[#allocation7 + $0x164] ss:$16 sps:$4 sm:$0xff]   ;;  %v4941_v45 = vld [vmem:[#allocation7 + $0x16c] ss:$16 sps:$4 sm:$0xff]   ;;  %v4943_v46 = vld [vmem:[#allocation7 + $0x160] ss:$16 sps:$4 sm:$0xff]  }
  0x80   :  { %v4944_v47 = vld [vmem:[#allocation7 + $0x168] ss:$16 sps:$4 sm:$0xff]   ;;  %v4945_v49 = vld [vmem:[#allocation7 + $0x184] ss:$16 sps:$4 sm:$0xff]   ;;  %v4947_v50 = vld [vmem:[#allocation7 + $0x18c] ss:$16 sps:$4 sm:$0xff]  }
  0x81   :  { %v4971_v48 = vld [vmem:[#allocation2 + $0x4] ss:$28 sps:$4 sm:$0xff]   ;;  %v4949_v51 = vld [vmem:[#allocation7 + $0x180] ss:$16 sps:$4 sm:$0xff]   ;;  %v4951_v53 = vld [vmem:[#allocation7 + $0x1a4] ss:$16 sps:$4 sm:$0xff]  }
  0x82   :  { %1376 = vmatpush1.bf16.msra.mxu0 %v4901_v18  ;;  %1548 = vmatpush1.bf16.msra.mxu1 %v4902_v19  ;;  %v4950_v52 = vld [vmem:[#allocation7 + $0x188] ss:$16 sps:$4 sm:$0xff]   ;;  %v4953_v54 = vld [vmem:[#allocation7 + $0x1ac] ss:$16 sps:$4 sm:$0xff]   ;;  %v4955_v55 = vld [vmem:[#allocation7 + $0x1a0] ss:$16 sps:$4 sm:$0xff]  }
  0x83   :  { %1377 = vmatprep.subr.bf16.mxu0 %v4903_v20  ;;  %1549 = vmatprep.subr.bf16.mxu1 %v4905_v21  ;;  %v4956_v56 = vld [vmem:[#allocation7 + $0x1a8] ss:$16 sps:$4 sm:$0xff]   ;;  %v4957_v57 = vld [vmem:[#allocation7 + $0x1c4] ss:$16 sps:$4 sm:$0xff]   ;;  %v4959_v58 = vld [vmem:[#allocation7 + $0x1cc] ss:$16 sps:$4 sm:$0xff]  }
  0x84   :  { %1399 = vmatprep.mubr.bf16.mxu0 %v4971_v48  ;;  %1571 = vmatprep.mubr.bf16.mxu1 %v4971_v48  ;;  %v4961_v59 = vld [vmem:[#allocation7 + $0x1c0] ss:$16 sps:$4 sm:$0xff]   ;;  %v4962_v60 = vld [vmem:[#allocation7 + $0x1c8] ss:$16 sps:$4 sm:$0xff]   ;;  %v4963_v61 = vld [vmem:[#allocation7 + $0x1e4] ss:$16 sps:$4 sm:$0xff]  }
  0x85   :  { %v4965_v62 = vld [vmem:[#allocation7 + $0x1ec] ss:$16 sps:$4 sm:$0xff]   ;;  %v4967_v63 = vld [vmem:[#allocation7 + $0x1e0] ss:$16 sps:$4 sm:$0xff]   ;;  %v4968_v0 = vld [vmem:[#allocation7 + $0x1e8] ss:$16 sps:$4 sm:$0xff]  }
  0x86   :  { %1378 = vmatpush1.bf16.msra.mxu0 %v4907_v22  ;;  %1550 = vmatpush1.bf16.msra.mxu1 %v4908_v23  ;;  %v4974_v1 = vld [vmem:[#allocation7 + $0x204] ss:$16 sps:$4 sm:$0xff]   ;;  %v4977_v2 = vld [vmem:[#allocation7 + $0x20c] ss:$16 sps:$4 sm:$0xff]   ;;  %v4972_v4 = vld [vmem:[#allocation7 + $0x200] ss:$16 sps:$4 sm:$0xff]  }
  0x87   :  { %1379 = vmatprep.subr.bf16.mxu0 %v4909_v24  ;;  %1551 = vmatprep.subr.bf16.mxu1 %v4911_v25  ;;  %v4969_v3 = vld [vmem:[#allocation2] ss:$28 sps:$4 sm:$0xff]   ;;  %v4983_v7 = vld [vmem:[#allocation7 + $0x22c] ss:$16 sps:$4 sm:$0xff]   ;;  %v4978_v8 = vld [vmem:[#allocation7 + $0x220] ss:$16 sps:$4 sm:$0xff]  }
  0x88   :  { %v4975_v5 = vld [vmem:[#allocation7 + $0x208] ss:$16 sps:$4 sm:$0xff]   ;;  %v4980_v6 = vld [vmem:[#allocation7 + $0x224] ss:$16 sps:$4 sm:$0xff]   ;;  %v4989_v11 = vld [vmem:[#allocation7 + $0x24c] ss:$16 sps:$4 sm:$0xff]  }
  0x89   :  { %v4981_v9 = vld [vmem:[#allocation7 + $0x228] ss:$16 sps:$4 sm:$0xff]   ;;  %v4986_v10 = vld [vmem:[#allocation7 + $0x244] ss:$16 sps:$4 sm:$0xff]   ;;  %v4984_v12 = vld [vmem:[#allocation7 + $0x240] ss:$16 sps:$4 sm:$0xff]  }
  0x8a   :  { %1380 = vmatpush1.bf16.msra.mxu0 %v4913_v26  ;;  %1552 = vmatpush1.bf16.msra.mxu1 %v4914_v27  ;;  %v4987_v13 = vld [vmem:[#allocation7 + $0x248] ss:$16 sps:$4 sm:$0xff]   ;;  %v4992_v14 = vld [vmem:[#allocation7 + $0x264] ss:$16 sps:$4 sm:$0xff]   ;;  %v4995_v15 = vld [vmem:[#allocation7 + $0x26c] ss:$16 sps:$4 sm:$0xff]  }
  0x8b   :  { %1381 = vmatprep.subr.bf16.mxu0 %v4915_v28  ;;  %1553 = vmatprep.subr.bf16.mxu1 %v4917_v29  ;;  %v4990_v16 = vld [vmem:[#allocation7 + $0x260] ss:$16 sps:$4 sm:$0xff]   ;;  %v4993_v17 = vld [vmem:[#allocation7 + $0x268] ss:$16 sps:$4 sm:$0xff]   ;;  %v4998_v18 = vld [vmem:[#allocation7 + $0x284] ss:$16 sps:$4 sm:$0xff]  }
  0x8c   :  { %v5001_v19 = vld [vmem:[#allocation7 + $0x28c] ss:$16 sps:$4 sm:$0xff]   ;;  %v4996_v20 = vld [vmem:[#allocation7 + $0x280] ss:$16 sps:$4 sm:$0xff]   ;;  %v4999_v21 = vld [vmem:[#allocation7 + $0x288] ss:$16 sps:$4 sm:$0xff]  }
  0x8d   :  { %v5004_v22 = vld [vmem:[#allocation7 + $0x2a4] ss:$16 sps:$4 sm:$0xff]   ;;  %v5007_v23 = vld [vmem:[#allocation7 + $0x2ac] ss:$16 sps:$4 sm:$0xff]   ;;  %v5002_v24 = vld [vmem:[#allocation7 + $0x2a0] ss:$16 sps:$4 sm:$0xff]  }
  0x8e   :  { %1382 = vmatpush1.bf16.msra.mxu0 %v4919_v30  ;;  %1554 = vmatpush1.bf16.msra.mxu1 %v4920_v31  ;;  %v5005_v25 = vld [vmem:[#allocation7 + $0x2a8] ss:$16 sps:$4 sm:$0xff]   ;;  %v5010_v26 = vld [vmem:[#allocation7 + $0x2c4] ss:$16 sps:$4 sm:$0xff]   ;;  %v5013_v27 = vld [vmem:[#allocation7 + $0x2cc] ss:$16 sps:$4 sm:$0xff]  }
  0x8f   :  { %1383 = vmatprep.subr.bf16.mxu0 %v4921_v32  ;;  %1555 = vmatprep.subr.bf16.mxu1 %v4923_v33  ;;  %v5008_v28 = vld [vmem:[#allocation7 + $0x2c0] ss:$16 sps:$4 sm:$0xff]   ;;  %v5011_v29 = vld [vmem:[#allocation7 + $0x2c8] ss:$16 sps:$4 sm:$0xff]   ;;  %v5016_v31 = vld [vmem:[#allocation7 + $0x2e4] ss:$16 sps:$4 sm:$0xff]  }
  0x90   :  { %v5070_v30 = vld [vmem:[#allocation2 + $0xc] ss:$28 sps:$4 sm:$0xff]   ;;  %v5019_v32 = vld [vmem:[#allocation7 + $0x2ec] ss:$16 sps:$4 sm:$0xff]   ;;  %vm1363_vm0 = vcmask 130048   ;;  %vm2151_vm1 = vcmask 1041408  }
  0x91   :  { %v5014_v33 = vld [vmem:[#allocation7 + $0x2e0] ss:$16 sps:$4 sm:$0xff]   ;;  %v5043_v48 = vld [vmem:[#allocation7 + $0x36c] ss:$16 sps:$4 sm:$0xff]   ;;  %vm2147_vm2 = vcmask 162816  }
  0x92   :  { %1384 = vmatpush1.bf16.msra.mxu0 %v4925_v34  ;;  %1556 = vmatpush1.bf16.msra.mxu1 %v4926_v35  ;;  %v5017_v34 = vld [vmem:[#allocation7 + $0x2e8] ss:$16 sps:$4 sm:$0xff]   ;;  %v5022_v35 = vld [vmem:[#allocation7 + $0x304] ss:$16 sps:$4 sm:$0xff]  }
  0x93   :  { %1385 = vmatprep.subr.bf16.mxu0 %v4927_v36  ;;  %1557 = vmatprep.subr.bf16.mxu1 %v4929_v37  ;;  %v5025_v36 = vld [vmem:[#allocation7 + $0x30c] ss:$16 sps:$4 sm:$0xff]   ;;  %v5020_v37 = vld [vmem:[#allocation7 + $0x300] ss:$16 sps:$4 sm:$0xff]  }
  0x96   :  { %1386 = vmatpush1.bf16.msra.mxu0 %v4931_v38  ;;  %1558 = vmatpush1.bf16.msra.mxu1 %v4932_v39  ;;  %v5023_v38 = vld [vmem:[#allocation7 + $0x308] ss:$16 sps:$4 sm:$0xff]   ;;  %v5028_v39 = vld [vmem:[#allocation7 + $0x324] ss:$16 sps:$4 sm:$0xff]  }
  0x97   :  { %1387 = vmatprep.subr.bf16.mxu0 %v4933_v40  ;;  %1559 = vmatprep.subr.bf16.mxu1 %v4935_v41  ;;  %v5031_v40 = vld [vmem:[#allocation7 + $0x32c] ss:$16 sps:$4 sm:$0xff]   ;;  %v5026_v41 = vld [vmem:[#allocation7 + $0x320] ss:$16 sps:$4 sm:$0xff]  }
  0x9a   :  { %1388 = vmatpush1.bf16.msra.mxu0 %v4937_v42  ;;  %1560 = vmatpush1.bf16.msra.mxu1 %v4938_v43  ;;  %v5029_v42 = vld [vmem:[#allocation7 + $0x328] ss:$16 sps:$4 sm:$0xff]   ;;  %v5034_v43 = vld [vmem:[#allocation7 + $0x344] ss:$16 sps:$4 sm:$0xff]  }
  0x9b   :  { %1389 = vmatprep.subr.bf16.mxu0 %v4939_v44  ;;  %1561 = vmatprep.subr.bf16.mxu1 %v4941_v45  ;;  %v5037_v44 = vld [vmem:[#allocation7 + $0x34c] ss:$16 sps:$4 sm:$0xff]   ;;  %v5032_v45 = vld [vmem:[#allocation7 + $0x340] ss:$16 sps:$4 sm:$0xff]  }
  0x9e   :  { %1390 = vmatpush1.bf16.msra.mxu0 %v4943_v46  ;;  %1562 = vmatpush1.bf16.msra.mxu1 %v4944_v47  ;;  %v5035_v46 = vld [vmem:[#allocation7 + $0x348] ss:$16 sps:$4 sm:$0xff]   ;;  %v5040_v47 = vld [vmem:[#allocation7 + $0x364] ss:$16 sps:$4 sm:$0xff]  }
  0x9f   :  { %1391 = vmatprep.subr.bf16.mxu0 %v4945_v49  ;;  %1563 = vmatprep.subr.bf16.mxu1 %v4947_v50  ;;  %v5038_v49 = vld [vmem:[#allocation7 + $0x360] ss:$16 sps:$4 sm:$0xff]   ;;  %v5041_v50 = vld [vmem:[#allocation7 + $0x368] ss:$16 sps:$4 sm:$0xff]  }
  0xa2   :  { %1392 = vmatpush1.bf16.msra.mxu0 %v4949_v51  ;;  %1564 = vmatpush1.bf16.msra.mxu1 %v4950_v52  ;;  %v5046_v51 = vld [vmem:[#allocation7 + $0x384] ss:$16 sps:$4 sm:$0xff]   ;;  %v5049_v52 = vld [vmem:[#allocation7 + $0x38c] ss:$16 sps:$4 sm:$0xff]  }
  0xa3   :  { %1393 = vmatprep.subr.bf16.mxu0 %v4951_v53  ;;  %1565 = vmatprep.subr.bf16.mxu1 %v4953_v54  ;;  %v5044_v53 = vld [vmem:[#allocation7 + $0x380] ss:$16 sps:$4 sm:$0xff]   ;;  %v5047_v54 = vld [vmem:[#allocation7 + $0x388] ss:$16 sps:$4 sm:$0xff]  }
  0xa6   :  { %1394 = vmatpush1.bf16.msra.mxu0 %v4955_v55  ;;  %1566 = vmatpush1.bf16.msra.mxu1 %v4956_v56  ;;  %v5052_v55 = vld [vmem:[#allocation7 + $0x3a4] ss:$16 sps:$4 sm:$0xff]   ;;  %v5055_v56 = vld [vmem:[#allocation7 + $0x3ac] ss:$16 sps:$4 sm:$0xff]  }
  0xa7   :  { %1395 = vmatprep.subr.bf16.mxu0 %v4957_v57  ;;  %1567 = vmatprep.subr.bf16.mxu1 %v4959_v58  ;;  %v5050_v57 = vld [vmem:[#allocation7 + $0x3a0] ss:$16 sps:$4 sm:$0xff]   ;;  %v5053_v58 = vld [vmem:[#allocation7 + $0x3a8] ss:$16 sps:$4 sm:$0xff]  }
  0xaa   :  { %1396 = vmatpush1.bf16.msra.mxu0 %v4961_v59  ;;  %1568 = vmatpush1.bf16.msra.mxu1 %v4962_v60  ;;  %v5058_v59 = vld [vmem:[#allocation7 + $0x3c4] ss:$16 sps:$4 sm:$0xff]   ;;  %v5061_v60 = vld [vmem:[#allocation7 + $0x3cc] ss:$16 sps:$4 sm:$0xff]  }
  0xab   :  { %1397 = vmatprep.subr.bf16.mxu0 %v4963_v61  ;;  %1569 = vmatprep.subr.bf16.mxu1 %v4965_v62  ;;  %v5056_v61 = vld [vmem:[#allocation7 + $0x3c0] ss:$16 sps:$4 sm:$0xff]   ;;  %v5059_v62 = vld [vmem:[#allocation7 + $0x3c8] ss:$16 sps:$4 sm:$0xff]  }
  0xae   :  { %1398 = vmatpush1.bf16.msra.mxu0 %v4967_v63  ;;  %1570 = vmatpush1.bf16.msra.mxu1 %v4968_v0  ;;  %v5064_v63 = vld [vmem:[#allocation7 + $0x3e4] ss:$16 sps:$4 sm:$0xff]   ;;  %v5067_v0 = vld [vmem:[#allocation7 + $0x3ec] ss:$16 sps:$4 sm:$0xff]  }
  0xaf   :  { %1410 = vmatprep.subr.bf16.mxu0 %v4974_v1  ;;  %1582 = vmatprep.subr.bf16.mxu1 %v4977_v2  ;;  %v5062_v1 = vld [vmem:[#allocation7 + $0x3e0] ss:$16 sps:$4 sm:$0xff]   ;;  %v5065_v2 = vld [vmem:[#allocation7 + $0x3e8] ss:$16 sps:$4 sm:$0xff]  }
  0xb1   :  { %1400 = vmatmul.mubr.bf16.vlgmr.msra.gmra.mrb[0].mxu0 %v4969_v3  ;;  %1572 = vmatmul.mubr.bf16.vlgmr.msra.gmra.mrb[0].mxu1 %v4969_v3  ;;  %v5073_v3 = vld [vmem:[#allocation7 + $0x404] ss:$16 sps:$4 sm:$0xff]  }
  0xb2   :  { %1411 = vmatpush1.bf16.msra.mxu0 %v4972_v4  ;;  %1583 = vmatpush1.bf16.msra.mxu1 %v4975_v5  ;;  %v5076_v4 = vld [vmem:[#allocation7 + $0x40c] ss:$16 sps:$4 sm:$0xff]  }
  0xb3   :  { %1412 = vmatprep.subr.bf16.mxu0 %v4980_v6  ;;  %1584 = vmatprep.subr.bf16.mxu1 %v4983_v7  ;;  %v5068_v5 = vld [vmem:[#allocation2 + $0x8] ss:$28 sps:$4 sm:$0xff]   ;;  %v5074_v7 = vld [vmem:[#allocation7 + $0x408] ss:$16 sps:$4 sm:$0xff]  }
  0xb4   :  { %1442 = vmatprep.mubr.bf16.mxu0 %v5070_v30  ;;  %1614 = vmatprep.mubr.bf16.mxu1 %v5070_v30  ;;  %v5071_v6 = vld [vmem:[#allocation7 + $0x400] ss:$16 sps:$4 sm:$0xff]   ;;  %v5112_v30 = vld [vmem:[#allocation7 + $0x4cc] ss:$16 sps:$4 sm:$0xff]  }
  0xb6   :  { %1413 = vmatpush1.bf16.msra.mxu0 %v4978_v8  ;;  %1585 = vmatpush1.bf16.msra.mxu1 %v4981_v9  ;;  %v5079_v8 = vld [vmem:[#allocation7 + $0x424] ss:$16 sps:$4 sm:$0xff]   ;;  %v5082_v9 = vld [vmem:[#allocation7 + $0x42c] ss:$16 sps:$4 sm:$0xff]  }
  0xb7   :  { %1414 = vmatprep.subr.bf16.mxu0 %v4986_v10  ;;  %1586 = vmatprep.subr.bf16.mxu1 %v4989_v11  ;;  %v5077_v10 = vld [vmem:[#allocation7 + $0x420] ss:$16 sps:$4 sm:$0xff]   ;;  %v5080_v11 = vld [vmem:[#allocation7 + $0x428] ss:$16 sps:$4 sm:$0xff]  }
  0xba   :  { %1415 = vmatpush1.bf16.msra.mxu0 %v4984_v12  ;;  %1587 = vmatpush1.bf16.msra.mxu1 %v4987_v13  ;;  %v5169_v12 = vld [vmem:[#allocation2 + $0x14] ss:$28 sps:$4 sm:$0xff]   ;;  %v5085_v13 = vld [vmem:[#allocation7 + $0x444] ss:$16 sps:$4 sm:$0xff]  }
  0xbb   :  { %1416 = vmatprep.subr.bf16.mxu0 %v4992_v14  ;;  %1588 = vmatprep.subr.bf16.mxu1 %v4995_v15  ;;  %v5088_v14 = vld [vmem:[#allocation7 + $0x44c] ss:$16 sps:$4 sm:$0xff]   ;;  %v5083_v15 = vld [vmem:[#allocation7 + $0x440] ss:$16 sps:$4 sm:$0xff]  }
  0xbe   :  { %1417 = vmatpush1.bf16.msra.mxu0 %v4990_v16  ;;  %1589 = vmatpush1.bf16.msra.mxu1 %v4993_v17  ;;  %v5086_v16 = vld [vmem:[#allocation7 + $0x448] ss:$16 sps:$4 sm:$0xff]   ;;  %v5091_v17 = vld [vmem:[#allocation7 + $0x464] ss:$16 sps:$4 sm:$0xff]  }
  0xbf   :  { %1418 = vmatprep.subr.bf16.mxu0 %v4998_v18  ;;  %1590 = vmatprep.subr.bf16.mxu1 %v5001_v19  ;;  %v5094_v18 = vld [vmem:[#allocation7 + $0x46c] ss:$16 sps:$4 sm:$0xff]   ;;  %v5089_v19 = vld [vmem:[#allocation7 + $0x460] ss:$16 sps:$4 sm:$0xff]  }
  0xc2   :  { %1419 = vmatpush1.bf16.msra.mxu0 %v4996_v20  ;;  %1591 = vmatpush1.bf16.msra.mxu1 %v4999_v21  ;;  %v5092_v20 = vld [vmem:[#allocation7 + $0x468] ss:$16 sps:$4 sm:$0xff]   ;;  %v5097_v21 = vld [vmem:[#allocation7 + $0x484] ss:$16 sps:$4 sm:$0xff]  }
  0xc3   :  { %1420 = vmatprep.subr.bf16.mxu0 %v5004_v22  ;;  %1592 = vmatprep.subr.bf16.mxu1 %v5007_v23  ;;  %v5100_v22 = vld [vmem:[#allocation7 + $0x48c] ss:$16 sps:$4 sm:$0xff]   ;;  %v5095_v23 = vld [vmem:[#allocation7 + $0x480] ss:$16 sps:$4 sm:$0xff]  }
  0xc6   :  { %1421 = vmatpush1.bf16.msra.mxu0 %v5002_v24  ;;  %1593 = vmatpush1.bf16.msra.mxu1 %v5005_v25  ;;  %v5098_v24 = vld [vmem:[#allocation7 + $0x488] ss:$16 sps:$4 sm:$0xff]   ;;  %v5103_v25 = vld [vmem:[#allocation7 + $0x4a4] ss:$16 sps:$4 sm:$0xff]  }
  0xc7   :  { %1422 = vmatprep.subr.bf16.mxu0 %v5010_v26  ;;  %1594 = vmatprep.subr.bf16.mxu1 %v5013_v27  ;;  %v5106_v26 = vld [vmem:[#allocation7 + $0x4ac] ss:$16 sps:$4 sm:$0xff]   ;;  %v5101_v27 = vld [vmem:[#allocation7 + $0x4a0] ss:$16 sps:$4 sm:$0xff]  }
  0xca   :  { %1423 = vmatpush1.bf16.msra.mxu0 %v5008_v28  ;;  %1595 = vmatpush1.bf16.msra.mxu1 %v5011_v29  ;;  %v5104_v28 = vld [vmem:[#allocation7 + $0x4a8] ss:$16 sps:$4 sm:$0xff]   ;;  %v5109_v29 = vld [vmem:[#allocation7 + $0x4c4] ss:$16 sps:$4 sm:$0xff]  }
  0xcb   :  { %1424 = vmatprep.subr.bf16.mxu0 %v5016_v31  ;;  %1596 = vmatprep.subr.bf16.mxu1 %v5019_v32  ;;  %v5107_v31 = vld [vmem:[#allocation7 + $0x4c0] ss:$16 sps:$4 sm:$0xff]   ;;  %v5110_v32 = vld [vmem:[#allocation7 + $0x4c8] ss:$16 sps:$4 sm:$0xff]  }
  0xce   :  { %1425 = vmatpush1.bf16.msra.mxu0 %v5014_v33  ;;  %1597 = vmatpush1.bf16.msra.mxu1 %v5017_v34  ;;  %v5115_v33 = vld [vmem:[#allocation7 + $0x4e4] ss:$16 sps:$4 sm:$0xff]   ;;  %v5118_v34 = vld [vmem:[#allocation7 + $0x4ec] ss:$16 sps:$4 sm:$0xff]  }
  0xcf   :  { %1426 = vmatprep.subr.bf16.mxu0 %v5022_v35  ;;  %1598 = vmatprep.subr.bf16.mxu1 %v5025_v36  ;;  %v5113_v35 = vld [vmem:[#allocation7 + $0x4e0] ss:$16 sps:$4 sm:$0xff]   ;;  %v5116_v36 = vld [vmem:[#allocation7 + $0x4e8] ss:$16 sps:$4 sm:$0xff]  }
  0xd2   :  { %1427 = vmatpush1.bf16.msra.mxu0 %v5020_v37  ;;  %1599 = vmatpush1.bf16.msra.mxu1 %v5023_v38  ;;  %v5121_v37 = vld [vmem:[#allocation7 + $0x504] ss:$16 sps:$4 sm:$0xff]   ;;  %v5124_v38 = vld [vmem:[#allocation7 + $0x50c] ss:$16 sps:$4 sm:$0xff]  }
  0xd3   :  { %1428 = vmatprep.subr.bf16.mxu0 %v5028_v39  ;;  %1600 = vmatprep.subr.bf16.mxu1 %v5031_v40  ;;  %v5119_v39 = vld [vmem:[#allocation7 + $0x500] ss:$16 sps:$4 sm:$0xff]   ;;  %v5122_v40 = vld [vmem:[#allocation7 + $0x508] ss:$16 sps:$4 sm:$0xff]  }
  0xd6   :  { %1429 = vmatpush1.bf16.msra.mxu0 %v5026_v41  ;;  %1601 = vmatpush1.bf16.msra.mxu1 %v5029_v42  ;;  %v5127_v41 = vld [vmem:[#allocation7 + $0x524] ss:$16 sps:$4 sm:$0xff]   ;;  %v5130_v42 = vld [vmem:[#allocation7 + $0x52c] ss:$16 sps:$4 sm:$0xff]  }
  0xd7   :  { %1430 = vmatprep.subr.bf16.mxu0 %v5034_v43  ;;  %1602 = vmatprep.subr.bf16.mxu1 %v5037_v44  ;;  %v5125_v43 = vld [vmem:[#allocation7 + $0x520] ss:$16 sps:$4 sm:$0xff]   ;;  %v5128_v44 = vld [vmem:[#allocation7 + $0x528] ss:$16 sps:$4 sm:$0xff]  }
  0xda   :  { %1431 = vmatpush1.bf16.msra.mxu0 %v5032_v45  ;;  %1603 = vmatpush1.bf16.msra.mxu1 %v5035_v46  ;;  %v5133_v45 = vld [vmem:[#allocation7 + $0x544] ss:$16 sps:$4 sm:$0xff]   ;;  %v5136_v46 = vld [vmem:[#allocation7 + $0x54c] ss:$16 sps:$4 sm:$0xff]  }
  0xdb   :  { %1432 = vmatprep.subr.bf16.mxu0 %v5040_v47  ;;  %1604 = vmatprep.subr.bf16.mxu1 %v5043_v48  ;;  %v5131_v47 = vld [vmem:[#allocation7 + $0x540] ss:$16 sps:$4 sm:$0xff]   ;;  %v5134_v48 = vld [vmem:[#allocation7 + $0x548] ss:$16 sps:$4 sm:$0xff]  }
  0xde   :  { %1433 = vmatpush1.bf16.msra.mxu0 %v5038_v49  ;;  %1605 = vmatpush1.bf16.msra.mxu1 %v5041_v50  ;;  %v5139_v49 = vld [vmem:[#allocation7 + $0x564] ss:$16 sps:$4 sm:$0xff]   ;;  %v5142_v50 = vld [vmem:[#allocation7 + $0x56c] ss:$16 sps:$4 sm:$0xff]  }
  0xdf   :  { %1434 = vmatprep.subr.bf16.mxu0 %v5046_v51  ;;  %1606 = vmatprep.subr.bf16.mxu1 %v5049_v52  ;;  %v5137_v51 = vld [vmem:[#allocation7 + $0x560] ss:$16 sps:$4 sm:$0xff]   ;;  %v5140_v52 = vld [vmem:[#allocation7 + $0x568] ss:$16 sps:$4 sm:$0xff]  }
  0xe2   :  { %1435 = vmatpush1.bf16.msra.mxu0 %v5044_v53  ;;  %1607 = vmatpush1.bf16.msra.mxu1 %v5047_v54  ;;  %v5145_v53 = vld [vmem:[#allocation7 + $0x584] ss:$16 sps:$4 sm:$0xff]   ;;  %v5148_v54 = vld [vmem:[#allocation7 + $0x58c] ss:$16 sps:$4 sm:$0xff]  }
  0xe3   :  { %1436 = vmatprep.subr.bf16.mxu0 %v5052_v55  ;;  %1608 = vmatprep.subr.bf16.mxu1 %v5055_v56  ;;  %v5143_v55 = vld [vmem:[#allocation7 + $0x580] ss:$16 sps:$4 sm:$0xff]   ;;  %v5146_v56 = vld [vmem:[#allocation7 + $0x588] ss:$16 sps:$4 sm:$0xff]  }
  0xe6   :  { %1437 = vmatpush1.bf16.msra.mxu0 %v5050_v57  ;;  %1609 = vmatpush1.bf16.msra.mxu1 %v5053_v58  ;;  %v5151_v57 = vld [vmem:[#allocation7 + $0x5a4] ss:$16 sps:$4 sm:$0xff]   ;;  %v5154_v58 = vld [vmem:[#allocation7 + $0x5ac] ss:$16 sps:$4 sm:$0xff]  }
  0xe7   :  { %1438 = vmatprep.subr.bf16.mxu0 %v5058_v59  ;;  %1610 = vmatprep.subr.bf16.mxu1 %v5061_v60  ;;  %v5149_v59 = vld [vmem:[#allocation7 + $0x5a0] ss:$16 sps:$4 sm:$0xff]   ;;  %v5152_v60 = vld [vmem:[#allocation7 + $0x5a8] ss:$16 sps:$4 sm:$0xff]  }
  0xea   :  { %1439 = vmatpush1.bf16.msra.mxu0 %v5056_v61  ;;  %1611 = vmatpush1.bf16.msra.mxu1 %v5059_v62  ;;  %v5157_v61 = vld [vmem:[#allocation7 + $0x5c4] ss:$16 sps:$4 sm:$0xff]   ;;  %v5160_v62 = vld [vmem:[#allocation7 + $0x5cc] ss:$16 sps:$4 sm:$0xff]  }
  0xeb   :  { %1440 = vmatprep.subr.bf16.mxu0 %v5064_v63  ;;  %1612 = vmatprep.subr.bf16.mxu1 %v5067_v0  ;;  %v5155_v63 = vld [vmem:[#allocation7 + $0x5c0] ss:$16 sps:$4 sm:$0xff]   ;;  %v5158_v0 = vld [vmem:[#allocation7 + $0x5c8] ss:$16 sps:$4 sm:$0xff]  }
  0xee   :  { %1441 = vmatpush1.bf16.msra.mxu0 %v5062_v1  ;;  %1613 = vmatpush1.bf16.msra.mxu1 %v5065_v2  ;;  %v5163_v1 = vld [vmem:[#allocation7 + $0x5e4] ss:$16 sps:$4 sm:$0xff]   ;;  %v5166_v2 = vld [vmem:[#allocation7 + $0x5ec] ss:$16 sps:$4 sm:$0xff]  }
  0xef   :  { %1453 = vmatprep.subr.bf16.mxu0 %v5073_v3  ;;  %1625 = vmatprep.subr.bf16.mxu1 %v5076_v4  ;;  %v5161_v3 = vld [vmem:[#allocation7 + $0x5e0] ss:$16 sps:$4 sm:$0xff]   ;;  %v5164_v4 = vld [vmem:[#allocation7 + $0x5e8] ss:$16 sps:$4 sm:$0xff]  }
  0xf1   :  { %1443 = vmatmul.mubr.bf16.vlgmr.msra.gmra.mrb[0].mxu0 %v5068_v5  ;;  %1615 = vmatmul.mubr.bf16.vlgmr.msra.gmra.mrb[0].mxu1 %v5068_v5  ;;  %v5172_v5 = vld [vmem:[#allocation7 + $0x604] ss:$16 sps:$4 sm:$0xff]  }
  0xf2   :  { %1454 = vmatpush1.bf16.msra.mxu0 %v5071_v6  ;;  %1626 = vmatpush1.bf16.msra.mxu1 %v5074_v7  ;;  %v5175_v6 = vld [vmem:[#allocation7 + $0x60c] ss:$16 sps:$4 sm:$0xff]   ;;  %v5167_v7 = vld [vmem:[#allocation2 + $0x10] ss:$28 sps:$4 sm:$0xff]  }
  0xf3   :  { %1455 = vmatprep.subr.bf16.mxu0 %v5079_v8  ;;  %1627 = vmatprep.subr.bf16.mxu1 %v5082_v9  ;;  %v5170_v8 = vld [vmem:[#allocation7 + $0x600] ss:$16 sps:$4 sm:$0xff]   ;;  %v5173_v9 = vld [vmem:[#allocation7 + $0x608] ss:$16 sps:$4 sm:$0xff]  }
  0xf4   :  { %1485 = vmatprep.mubr.bf16.mxu0 %v5169_v12  ;;  %1657 = vmatprep.mubr.bf16.mxu1 %v5169_v12  ;;  %v5176_v12 = vld [vmem:[#allocation2 + $0x18] ss:$28 sps:$4 sm:$0xff]  }
  0xf6   :  { %1456 = vmatpush1.bf16.msra.mxu0 %v5077_v10  ;;  %1628 = vmatpush1.bf16.msra.mxu1 %v5080_v11  ;;  %v5177_v10 = vld [vmem:[#allocation8 + $0x40] sm:$0xff]   ;;  %v5801_v11 = vmov 0  }
  0xf7   :  { %1457 = vmatprep.subr.bf16.mxu0 %v5085_v13  ;;  %1629 = vmatprep.subr.bf16.mxu1 %v5088_v14  ;;  %v5178_v13 = vld [vmem:[#allocation8] sm:$0xff]   ;;  %v5179_v14 = vld [vmem:[#allocation8 + $0x48] sm:$0xff]  }
  0xfa   :  { %1458 = vmatpush1.bf16.msra.mxu0 %v5083_v15  ;;  %1630 = vmatpush1.bf16.msra.mxu1 %v5086_v16  ;;  %v5180_v15 = vld [vmem:[#allocation8 + $0x8] sm:$0xff]   ;;  %v5181_v16 = vld [vmem:[#allocation8 + $0x50] sm:$0xff]  }
  0xfb   :  { %1459 = vmatprep.subr.bf16.mxu0 %v5091_v17  ;;  %1631 = vmatprep.subr.bf16.mxu1 %v5094_v18  ;;  %v5182_v17 = vld [vmem:[#allocation8 + $0x10] sm:$0xff]   ;;  %v5183_v18 = vld [vmem:[#allocation8 + $0x58] sm:$0xff]  }
  0xfe   :  { %1460 = vmatpush1.bf16.msra.mxu0 %v5089_v19  ;;  %1632 = vmatpush1.bf16.msra.mxu1 %v5092_v20  ;;  %v5184_v19 = vld [vmem:[#allocation8 + $0x18] sm:$0xff]   ;;  %v5185_v20 = vld [vmem:[#allocation8 + $0x60] sm:$0xff]  }
  0xff   :  { %1461 = vmatprep.subr.bf16.mxu0 %v5097_v21  ;;  %1633 = vmatprep.subr.bf16.mxu1 %v5100_v22  ;;  %v5186_v21 = vld [vmem:[#allocation8 + $0x20] sm:$0xff]   ;;  %v5187_v22 = vld [vmem:[#allocation8 + $0x68] sm:$0xff]  }
 0x102   :  { %1462 = vmatpush1.bf16.msra.mxu0 %v5095_v23  ;;  %1634 = vmatpush1.bf16.msra.mxu1 %v5098_v24  ;;  %v5188_v23 = vld [vmem:[#allocation8 + $0x28] sm:$0xff]   ;;  %v5189_v24 = vld [vmem:[#allocation8 + $0x70] sm:$0xff]  }
 0x103   :  { %1463 = vmatprep.subr.bf16.mxu0 %v5103_v25  ;;  %1635 = vmatprep.subr.bf16.mxu1 %v5106_v26  ;;  %v5190_v25 = vld [vmem:[#allocation8 + $0x30] sm:$0xff]   ;;  %v5191_v26 = vld [vmem:[#allocation8 + $0x78] sm:$0xff]  }
 0x106   :  { %1464 = vmatpush1.bf16.msra.mxu0 %v5101_v27  ;;  %1636 = vmatpush1.bf16.msra.mxu1 %v5104_v28  ;;  %v5192_v27 = vld [vmem:[#allocation8 + $0x38] sm:$0xff]   ;;  %v5193_v28 = vld [vmem:[#allocation8 + $0xc0] sm:$0xff]  }
 0x107   :  { %1465 = vmatprep.subr.bf16.mxu0 %v5109_v29  ;;  %1637 = vmatprep.subr.bf16.mxu1 %v5112_v30  ;;  %v328_v29 = vlaneseq }
 0x109   :  { %v5956_v30 = vshrl.u32 %v328_v29, 7 }
 0x10a   :  { %1466 = vmatpush1.bf16.msra.mxu0 %v5107_v31  ;;  %1638 = vmatpush1.bf16.msra.mxu1 %v5110_v32 }
 0x10b   :  { %1467 = vmatprep.subr.bf16.mxu0 %v5115_v33  ;;  %1639 = vmatprep.subr.bf16.mxu1 %v5118_v34  ;;  %v5959_v31 = vsub.s32 0, %v5956_v30  ;;  %v5962_v32 = vsub.s32 2, %v5956_v30  ;;  %v326_v33 = vld [vmem:[%s6064_s3] sm:$0xf]  ;;  %v5968_v34 = vsub.s32 1, %v5956_v30 }
 0x10e   :  { %1468 = vmatpush1.bf16.msra.mxu0 %v5113_v35  ;;  %1640 = vmatpush1.bf16.msra.mxu1 %v5116_v36  ;;  %v5971_v35 = vsub.s32 3, %v5956_v30  ;;  %v331_v36 = vrot.slane %v326_v33, %v5959_v31 }
 0x10f   :  { %1469 = vmatprep.subr.bf16.mxu0 %v5121_v37  ;;  %1641 = vmatprep.subr.bf16.mxu1 %v5124_v38  ;;  %v339_v37 = vrot.slane %v326_v33, %v5962_v32  ;;  %v335_v38 = vrot.slane %v326_v33, %v5968_v34 }
 0x112   :  { %1470 = vmatpush1.bf16.msra.mxu0 %v5119_v39  ;;  %1642 = vmatpush1.bf16.msra.mxu1 %v5122_v40  ;;  %v343_v39 = vrot.slane %v326_v33, %v5971_v35 }
 0x113   :  { %1471 = vmatprep.subr.bf16.mxu0 %v5127_v41  ;;  %1643 = vmatprep.subr.bf16.mxu1 %v5130_v42 }
 0x116   :  { %1472 = vmatpush1.bf16.msra.mxu0 %v5125_v43  ;;  %1644 = vmatpush1.bf16.msra.mxu1 %v5128_v44 }
 0x117   :  { %1473 = vmatprep.subr.bf16.mxu0 %v5133_v45  ;;  %1645 = vmatprep.subr.bf16.mxu1 %v5136_v46 }
 0x11a   :  { %1474 = vmatpush1.bf16.msra.mxu0 %v5131_v47  ;;  %1646 = vmatpush1.bf16.msra.mxu1 %v5134_v48 }
 0x11b   :  { %1475 = vmatprep.subr.bf16.mxu0 %v5139_v49  ;;  %1647 = vmatprep.subr.bf16.mxu1 %v5142_v50 }
 0x11e   :  { %1476 = vmatpush1.bf16.msra.mxu0 %v5137_v51  ;;  %1648 = vmatpush1.bf16.msra.mxu1 %v5140_v52 }
 0x11f   :  { %1477 = vmatprep.subr.bf16.mxu0 %v5145_v53  ;;  %1649 = vmatprep.subr.bf16.mxu1 %v5148_v54 }
 0x122   :  { %1478 = vmatpush1.bf16.msra.mxu0 %v5143_v55  ;;  %1650 = vmatpush1.bf16.msra.mxu1 %v5146_v56 }
 0x123   :  { %1479 = vmatprep.subr.bf16.mxu0 %v5151_v57  ;;  %1651 = vmatprep.subr.bf16.mxu1 %v5154_v58 }
 0x126   :  { %1480 = vmatpush1.bf16.msra.mxu0 %v5149_v59  ;;  %1652 = vmatpush1.bf16.msra.mxu1 %v5152_v60 }
 0x127   :  { %1481 = vmatprep.subr.bf16.mxu0 %v5157_v61  ;;  %1653 = vmatprep.subr.bf16.mxu1 %v5160_v62 }
 0x12a   :  { %1482 = vmatpush1.bf16.msra.mxu0 %v5155_v63  ;;  %1654 = vmatpush1.bf16.msra.mxu1 %v5158_v0 }
 0x12b   :  { %1483 = vmatprep.subr.bf16.mxu0 %v5163_v1  ;;  %1655 = vmatprep.subr.bf16.mxu1 %v5166_v2 }
 0x12e   :  { %1484 = vmatpush1.bf16.msra.mxu0 %v5161_v3  ;;  %1656 = vmatpush1.bf16.msra.mxu1 %v5164_v4  ;;  %v5194_v4 = vld [vmem:[#allocation8 + $0x80] sm:$0xff]  }
 0x12f   :  { %1496 = vmatprep.subr.bf16.mxu0 %v5172_v5  ;;  %1668 = vmatprep.subr.bf16.mxu1 %v5175_v6  ;;  %v5195_v5 = vld [vmem:[#allocation8 + $0xc8] sm:$0xff]  }
 0x130   :  { %v5196_v6 = vld [vmem:[#allocation8 + $0x88] sm:$0xff]  }
 0x131   :  { %1486 = vmatmul.mubr.bf16.vlgmr.msra.gmra.mrb[0].mxu0 %v5167_v7  ;;  %1658 = vmatmul.mubr.bf16.vlgmr.msra.gmra.mrb[0].mxu1 %v5167_v7  ;;  %v5197_v7 = vld [vmem:[#allocation8 + $0xd0] sm:$0xff]  }
 0x132   :  { %1497 = vmatpush1.bf16.msra.mxu0 %v5170_v8  ;;  %1669 = vmatpush1.bf16.msra.mxu1 %v5173_v9  ;;  %v5198_v8 = vld [vmem:[#allocation8 + $0x90] sm:$0xff]   ;;  %v5199_v9 = vld [vmem:[#allocation8 + $0xd8] sm:$0xff]  }
 0x133   :  { %1528 = vmatprep.mubr.bf16.mxu0 %v5801_v11  ;;  %1700 = vmatprep.mubr.bf16.mxu1 %v5801_v11 }
 0x134   :  { %4711 = vmatprep.subr.bf16.mxu1 %v5177_v10  ;;  %v5200_v10 = vld [vmem:[#allocation8 + $0x98] sm:$0xff]  }
 0x13d   :  { %4424 = vmatmul.mubr.msk.bf16.vlgmr.msra.gmra.mrb[0].mxu0 %vm1363_vm0, %v5176_v12  ;;  %4425 = vmatmul.mubr.msk.bf16.vlgmr.msra.gmra.mrb[0].mxu1 %vm1363_vm0, %v5176_v12  ;;  %v5201_v12 = vld [vmem:[#allocation8 + $0xe0] sm:$0xff]  }
 0x13e   :  { %4712 = vmatpush3.bf16.msra.mxu1 %v5178_v13  ;;  %2196 = vmatprep.mubr.bf16.mxu0 %v5801_v11  ;;  %v5202_v13 = vld [vmem:[#allocation8 + $0xa0] sm:$0xff]  }
 0x13f   :  { %4713 = vmatprep.subr.bf16.mxu1 %v5179_v14  ;;  %v5203_v14 = vld [vmem:[#allocation8 + $0xe8] sm:$0xff]  }
 0x142   :  { %4714 = vmatpush3.bf16.msra.mxu1 %v5180_v15  ;;  %v5204_v15 = vld [vmem:[#allocation8 + $0xa8] sm:$0xff]  }
 0x143   :  { %4715 = vmatprep.subr.bf16.mxu1 %v5181_v16  ;;  %v5205_v16 = vld [vmem:[#allocation8 + $0xf0] sm:$0xff]  }
 0x146   :  { %4716 = vmatpush3.bf16.msra.mxu1 %v5182_v17  ;;  %v5206_v17 = vld [vmem:[#allocation8 + $0xb0] sm:$0xff]  }
 0x147   :  { %4717 = vmatprep.subr.bf16.mxu1 %v5183_v18  ;;  %v5207_v18 = vld [vmem:[#allocation8 + $0xf8] sm:$0xff]  }
 0x14a   :  { %4718 = vmatpush3.bf16.msra.mxu1 %v5184_v19  ;;  %v5208_v19 = vld [vmem:[#allocation8 + $0xb8] sm:$0xff]  }
 0x14b   :  { %4719 = vmatprep.subr.bf16.mxu1 %v5185_v20 }
 0x14e   :  { %4720 = vmatpush3.bf16.msra.mxu1 %v5186_v21 }
 0x14f   :  { %4721 = vmatprep.subr.bf16.mxu1 %v5187_v22 }
 0x152   :  { %4722 = vmatpush3.bf16.msra.mxu1 %v5188_v23 }
 0x153   :  { %4723 = vmatprep.subr.bf16.mxu1 %v5189_v24 }
 0x156   :  { %4724 = vmatpush3.bf16.msra.mxu1 %v5190_v25 }
 0x157   :  { %4725 = vmatprep.subr.bf16.mxu1 %v5191_v26  ;;  %v4426_v26 = vld [vmem:[%s6066_s5] ss:$0 sm:$0xff]  ;;  %s5802_s5 = smov 108  }
 0x15a   :  { %4726 = vmatpush3.bf16.msra.mxu1 %v5192_v27 }
 0x15b   :  { %4733 = vmatprep.subr.bf16.mxu1 %v5193_v28 }
 0x210   :  { %v1530_v40 = vpop.f32.mrb[0].mxu0  ;;  %v1702_v41 = vpop.f32.mrb[0].mxu1 }
 0x211   :  { %v4799_v42 = vadd.f32 %v1530_v40, %v331_v36  ;;  %v4803_v43 = vadd.f32 %v1702_v41, %v339_v37  ;;  %v1532_v44 = vpop.f32.mrb[1].mxu0  ;;  %v1704_v45 = vpop.f32.mrb[1].mxu1 }
 0x212   :  { %v4800_v46 = vadd.f32 %v1532_v44, %v335_v38  ;;  %v4804_v47 = vadd.f32 %v1704_v45, %v343_v39  ;;  %v1534_v48 = vpop.f32.mrb[2].mxu0  ;;  %v1706_v49 = vpop.f32.mrb[2].mxu1  ;;  %v5211_v44 = vld [vmem:[#allocation10 + $0x4] ss:$16 sps:$4 sm:$0xff]   ;;  %v5209_v45 = vld [vmem:[#allocation10] ss:$16 sps:$4 sm:$0xff]  }
 0x213   :  { %v4801_v50 = vadd.f32 %v1534_v48, %v331_v36  ;;  %v4805_v51 = vadd.f32 %v1706_v49, %v339_v37  ;;  %v1536_v52 = vpop.f32.mrb[3].mxu0  ;;  %v1708_v53 = vpop.f32.mrb[3].mxu1  ;;  %v1711_v56 = vmax.f32 %v4799_v42, 0.0  ;;  %v1713_v57 = vmax.f32 %v4803_v43, 0.0  ;;  %2164 = vmatprep.subr.bf16.mxu0 %v5211_v44  ;;  %v2093_v49 = vld [vmem:[#allocation10 + $0x20] sm:$0x33] }
 0x214   :  { %v4802_v54 = vadd.f32 %v1536_v52, %v335_v38  ;;  %v4806_v55 = vadd.f32 %v1708_v53, %v343_v39  ;;  %v1712_v60 = vmax.f32 %v4800_v46, 0.0  ;;  %v1714_v61 = vmax.f32 %v4804_v47, 0.0  ;;  %v5212_v46 = vld [vmem:[#allocation10 + $0x8] ss:$16 sps:$4 sm:$0xff]   ;;  %v5214_v47 = vld [vmem:[#allocation10 + $0xc] ss:$16 sps:$4 sm:$0xff]   ;;  %2165 = vmatpush1.bf16.msra.mxu0 %v5209_v45 }
 0x215   :  { %v1715_v58 = vmax.f32 %v4801_v50, 0.0  ;;  %v1717_v59 = vmax.f32 %v4805_v51, 0.0  ;;  %v2094_v50 = vld [vmem:[#allocation10 + $0x28] sm:$0x33]  ;;  %v4464_v51 = vcombine.high %v2093_v49, %v2093_v49  ;;  %v4463_v53 = vcombine.low %v2093_v49, %v2093_v49  ;;  %v5270_v44 = vld [vmem:[#allocation11 + $0x1c8] ss:$28 sps:$4 sm:$0xff]  }
 0x216   :  { %v1716_v62 = vmax.f32 %v4802_v54, 0.0  ;;  %v1718_v63 = vmax.f32 %v4806_v55, 0.0  ;;  %v4466_v52 = vcombine.high %v2094_v50, %v2094_v50  ;;  %v4465_v54 = vcombine.low %v2094_v50, %v2094_v50  ;;  %v5275_v45 = vld [vmem:[#allocation11 + $0x1fc] ss:$28 sps:$4 sm:$0xff]   ;;  %v5281_v49 = vld [vmem:[#allocation11 + $0x234] ss:$28 sps:$4 sm:$0xff]  }
 0x217   :  { %v1719_v0 = vpack.c.bf16 %v1715_v58, %v1711_v56  ;;  %v1721_v1 = vpack.c.bf16 %v1717_v59, %v1713_v57  ;;  %4467 = vmatprep.subr.msk.bf16.mxu0 %vm2151_vm1, %v4464_v51  ;;  %v2153_v55 = vsel %vm2151_vm1, %v4463_v53, 0  ;;  %v5221_v57 = vld [vmem:[#allocation11 + $0x4] ss:$28 sps:$4 sm:$0xff]   ;;  %v5224_v58 = vld [vmem:[#allocation11 + $0xc] ss:$28 sps:$4 sm:$0xff]  }
 0x218   :  { %v1720_v2 = vpack.c.bf16 %v1716_v62, %v1712_v60  ;;  %v1722_v3 = vpack.c.bf16 %v1718_v63, %v1714_v61  ;;  %2167 = vmatpush1.bf16.msra.mxu0 %v2153_v55  ;;  %v2159_v56 = vsel %vm2151_vm1, %v4465_v54, 0  ;;  %v2068_v61 = vld [vmem:[#allocation5] sm:$0xff]  ;;  %v2069_v63 = vld [vmem:[#allocation5 + $0x8] sm:$0xff]  ;;  %v5284_v50 = vld [vmem:[#allocation11 + $0x23c] ss:$28 sps:$4 sm:$0xff]  }
 0x219   :  { %3707 = vmatprep.subr.bf16.mxu0 %v5221_v57  ;;  %v5279_v51 = vld [vmem:[#allocation11 + $0x230] ss:$28 sps:$4 sm:$0xff]   ;;  %v5285_v55 = vld [vmem:[#allocation11 + $0x268] ss:$28 sps:$4 sm:$0xff]  }
 0x21a   :  { %2018 = vmatprep.mubr.bf16.mxu1 %v1720_v2  ;;  %v5287_v53 = vld [vmem:[#allocation11 + $0x26c] ss:$28 sps:$4 sm:$0xff]   ;;  %v5290_v54 = vld [vmem:[#allocation11 + $0x274] ss:$28 sps:$4 sm:$0xff]   ;;  %v5293_v57 = vld [vmem:[#allocation11 + $0x2a4] ss:$28 sps:$4 sm:$0xff]  }
 0x21b   :  { %2019 = vmatmul.mubr.bf16.vlgmr.msra.gmra.mrb[4].mxu1 %v1719_v0 }
 0x21c   :  { %4734 = vmatpush3.bf16.msra.mxu1 %v5194_v4  ;;  %2059 = vmatprep.mubr.bf16.mxu1 %v1722_v3 }
 0x21d   :  { %4735 = vmatprep.subr.bf16.mxu1 %v5195_v5  ;;  %v5219_v5 = vld [vmem:[#allocation11] ss:$28 sps:$4 sm:$0xff]  }
 0x220   :  { %4736 = vmatpush3.bf16.msra.mxu1 %v5196_v6  ;;  %v5222_v6 = vld [vmem:[#allocation11 + $0x8] ss:$28 sps:$4 sm:$0xff]  }
 0x221   :  { %4737 = vmatprep.subr.bf16.mxu1 %v5197_v7 }
 0x224   :  { %4738 = vmatpush3.bf16.msra.mxu1 %v5198_v8  ;;  %v5227_v8 = vld [vmem:[#allocation11 + $0x3c] ss:$28 sps:$4 sm:$0xff]  }
 0x225   :  { %4739 = vmatprep.subr.bf16.mxu1 %v5199_v9  ;;  %v5230_v9 = vld [vmem:[#allocation11 + $0x44] ss:$28 sps:$4 sm:$0xff]  }
 0x228   :  { %4740 = vmatpush3.bf16.msra.mxu1 %v5200_v10  ;;  %v5225_v10 = vld [vmem:[#allocation11 + $0x38] ss:$28 sps:$4 sm:$0xff]  }
 0x229   :  { %4741 = vmatprep.subr.bf16.mxu1 %v5201_v12  ;;  %v5228_v12 = vld [vmem:[#allocation11 + $0x40] ss:$28 sps:$4 sm:$0xff]  }
 0x22c   :  { %4742 = vmatpush3.bf16.msra.mxu1 %v5202_v13  ;;  %v5233_v13 = vld [vmem:[#allocation11 + $0x74] ss:$28 sps:$4 sm:$0xff]  }
 0x22d   :  { %4743 = vmatprep.subr.bf16.mxu1 %v5203_v14  ;;  %v5236_v14 = vld [vmem:[#allocation11 + $0x7c] ss:$28 sps:$4 sm:$0xff]  }
 0x230   :  { %4744 = vmatpush3.bf16.msra.mxu1 %v5204_v15  ;;  %v5231_v15 = vld [vmem:[#allocation11 + $0x70] ss:$28 sps:$4 sm:$0xff]  }
 0x231   :  { %4745 = vmatprep.subr.bf16.mxu1 %v5205_v16  ;;  %v5234_v16 = vld [vmem:[#allocation11 + $0x78] ss:$28 sps:$4 sm:$0xff]  }
 0x234   :  { %4746 = vmatpush3.bf16.msra.mxu1 %v5206_v17  ;;  %v5239_v17 = vld [vmem:[#allocation11 + $0xac] ss:$28 sps:$4 sm:$0xff]  }
 0x235   :  { %4747 = vmatprep.subr.bf16.mxu1 %v5207_v18  ;;  %v5242_v18 = vld [vmem:[#allocation11 + $0xb4] ss:$28 sps:$4 sm:$0xff]  }
 0x238   :  { %4748 = vmatpush3.bf16.msra.mxu1 %v5208_v19  ;;  %v5237_v19 = vld [vmem:[#allocation11 + $0xa8] ss:$28 sps:$4 sm:$0xff]  }
 0x239   :  { %2207 = vmatprep.subr.bf16.mxu1 %v5214_v47  ;;  %v5273_v47 = vld [vmem:[#allocation11 + $0x1f8] ss:$28 sps:$4 sm:$0xff]  }
 0x23b   :  { %2060 = vmatmul.mubr.bf16.vlgmr.msra.gmra.mrb[8].mxu1 %v1721_v1 }
 0x23c   :  { %2239 = vmatprep.mubr.bf16.mxu1 %v5801_v11  ;;  %2208 = vmatpush1.bf16.msra.mxu1 %v5212_v46  ;;  %v5278_v46 = vld [vmem:[#allocation11 + $0x204] ss:$28 sps:$4 sm:$0xff]  }
 0x23d   :  { %4469 = vmatprep.subr.msk.bf16.mxu1 %vm2151_vm1, %v4466_v52  ;;  %v5282_v52 = vld [vmem:[#allocation11 + $0x238] ss:$28 sps:$4 sm:$0xff]  }
 0x240   :  { %2210 = vmatpush1.bf16.msra.mxu1 %v2159_v56  ;;  %v5288_v56 = vld [vmem:[#allocation11 + $0x270] ss:$28 sps:$4 sm:$0xff]  }
 0x241   :  { %3793 = vmatprep.subr.bf16.mxu1 %v5224_v58  ;;  %v5296_v58 = vld [vmem:[#allocation11 + $0x2ac] ss:$28 sps:$4 sm:$0xff]  }
 0x2ee   :  { %v4727_v20 = vpop.f32.mrb[4].mxu1 }
 0x2ef   :  { %v4728_v21 = vpop.f32.mrb[5].mxu1 }
 0x2f0   :  { %v4729_v22 = vadd.f32 %v4728_v21, %v4727_v20  ;;  %v4730_v23 = vpop.f32.mrb[6].mxu1  ;;  %v5240_v20 = vld [vmem:[#allocation11 + $0xb0] ss:$28 sps:$4 sm:$0xff]   ;;  %v5245_v21 = vld [vmem:[#allocation11 + $0xe4] ss:$28 sps:$4 sm:$0xff]  }
 0x2f1   :  { %v4731_v24 = vpop.f32.mrb[7].mxu1 }
 0x2f2   :  { %v4732_v25 = vadd.f32 %v4731_v24, %v4730_v23  ;;  %v2021_v29 = vadd.f32 %v4729_v22, %v4426_v26  ;;  %v5248_v22 = vld [vmem:[#allocation11 + $0xec] ss:$28 sps:$4 sm:$0xff]   ;;  %v5243_v23 = vld [vmem:[#allocation11 + $0xe0] ss:$28 sps:$4 sm:$0xff]  }
 0x2f3   :  { %v5246_v24 = vld [vmem:[#allocation11 + $0xe8] ss:$28 sps:$4 sm:$0xff]  }
 0x2f4   :  { %v2024_v38 = vadd.f32 %v4732_v25, %v4426_v26  ;;  %v5251_v25 = vld [vmem:[#allocation11 + $0x11c] ss:$28 sps:$4 sm:$0xff]   ;;  %v5254_v26 = vld [vmem:[#allocation11 + $0x124] ss:$28 sps:$4 sm:$0xff]  }
 0x30e   :  { %v4749_v27 = vpop.f32.mrb[8].mxu1 }
 0x30f   :  { %v4750_v28 = vpop.f32.mrb[9].mxu1 }
 0x310   :  { %v4751_v33 = vadd.f32 %v4750_v28, %v4749_v27  ;;  %v4752_v36 = vpop.f32.mrb[10].mxu1  ;;  %v5249_v27 = vld [vmem:[#allocation11 + $0x118] ss:$28 sps:$4 sm:$0xff]   ;;  %v5252_v28 = vld [vmem:[#allocation11 + $0x120] ss:$28 sps:$4 sm:$0xff]  }
 0x311   :  { %v4753_v37 = vpop.f32.mrb[11].mxu1 }
 0x312   :  { %v2062_v39 = vadd.f32 %v4751_v33, %v2021_v29  ;;  %v4754_v40 = vadd.f32 %v4753_v37, %v4752_v36  ;;  %v5257_v29 = vld [vmem:[#allocation11 + $0x154] ss:$28 sps:$4 sm:$0xff]   ;;  %v5260_v33 = vld [vmem:[#allocation11 + $0x15c] ss:$28 sps:$4 sm:$0xff]  }
 0x313   :  { %v5255_v36 = vld [vmem:[#allocation11 + $0x150] ss:$28 sps:$4 sm:$0xff]   ;;  %v5258_v37 = vld [vmem:[#allocation11 + $0x158] ss:$28 sps:$4 sm:$0xff]  }
 0x314   :  { %v2070_v11 = vmul.f32 0.5, %v2062_v39  ;;  %4183 = vst [vmem:[#allocation14] sm:$0xff] %v2062_v39  ;;  %v2065_v41 = vadd.f32 %v4754_v40, %v2024_v38  ;;  %v5263_v38 = vld [vmem:[#allocation11 + $0x18c] ss:$28 sps:$4 sm:$0xff]  }
 0x315   :  { %v5261_v40 = vld [vmem:[#allocation11 + $0x188] ss:$28 sps:$4 sm:$0xff]  }
 0x316   :  { %v2072_v42 = vmul.f32 1.442695, %v2070_v11  ;;  %v2071_v43 = vmul.f32 0.5, %v2065_v41  ;;  %4184 = vst [vmem:[#allocation14 + $0x8] sm:$0xff] %v2065_v41  ;;  %v5264_v11 = vld [vmem:[#allocation11 + $0x190] ss:$28 sps:$4 sm:$0xff]  }
 0x318   :  { %5539 = vpow2.f32 %v2072_v42  ;;  %v2074_v48 = vmul.f32 1.442695, %v2071_v43  ;;  %v5272_v42 = vld [vmem:[#allocation11 + $0x1cc] ss:$28 sps:$4 sm:$0xff]   ;;  %v5267_v43 = vld [vmem:[#allocation11 + $0x1c0] ss:$28 sps:$4 sm:$0xff]  }
 0x31a   :  { %5541 = vpow2.f32 %v2074_v48  ;;  %v5276_v48 = vld [vmem:[#allocation11 + $0x200] ss:$28 sps:$4 sm:$0xff]  }
 0x322   :  { %v5540_v59 = vpop.eup %5539 }
 0x323   :  { %2078 = vrot.lane.b32.xlu0 %v5540_v59, %s5802_s5  ;;  %v5291_v59 = vld [vmem:[#allocation11 + $0x2a0] ss:$28 sps:$4 sm:$0xff]  }
 0x324   :  { %v5542_v60 = vpop.eup %5541 }
 0x327   :  { %2080 = vrot.lane.b32.xlu0 %v5542_v60, %s5802_s5  ;;  %v5294_v60 = vld [vmem:[#allocation11 + $0x2a8] ss:$28 sps:$4 sm:$0xff]  }
 0x395   :  { %v2079_v62 = vpop.permute.xlu0 %2078 }
 0x396   :  { %v2084_v0 = vmul.f32 %v2079_v62, %v2068_v61  ;;  %v5299_v61 = vld [vmem:[#allocation11 + $0x2dc] ss:$28 sps:$4 sm:$0xff]   ;;  %v5302_v62 = vld [vmem:[#allocation11 + $0x2e4] ss:$28 sps:$4 sm:$0xff]  }
 0x398   :  { %v2086_v3 = vadd.f32 %v2084_v0, %v2062_v39  ;;  %v5266_v39 = vld [vmem:[#allocation11 + $0x194] ss:$28 sps:$4 sm:$0xff]   ;;  %v5300_v0 = vld [vmem:[#allocation11 + $0x2e0] ss:$28 sps:$4 sm:$0xff]  }
 0x399   :  { %v2081_v1 = vpop.permute.xlu0 %2080 }
 0x39a   :  { %v2085_v2 = vmul.f32 %v2081_v1, %v2069_v63  ;;  %v5297_v63 = vld [vmem:[#allocation11 + $0x2d8] ss:$28 sps:$4 sm:$0xff]  }
 0x39b   :  { %v5305_v1 = vld [vmem:[#allocation11 + $0x314] ss:$28 sps:$4 sm:$0xff]  }
 0x39c   :  { %v2087_v4 = vadd.f32 %v2085_v2, %v2065_v41  ;;  %v5269_v41 = vld [vmem:[#allocation11 + $0x1c4] ss:$28 sps:$4 sm:$0xff]   ;;  %v5308_v2 = vld [vmem:[#allocation11 + $0x31c] ss:$28 sps:$4 sm:$0xff]  }
 0x39e   :  { %v2088_v7 = vpack.c.bf16 %v2087_v4, %v2086_v3  ;;  %v5303_v3 = vld [vmem:[#allocation11 + $0x310] ss:$28 sps:$4 sm:$0xff]   ;;  %v5306_v4 = vld [vmem:[#allocation11 + $0x318] ss:$28 sps:$4 sm:$0xff]  }
 0x3a0   :  { %4468 = vmatmul.mubr.msk.bf16.vlgmr.msra.gmra.mrb[4].mxu0 %vm2147_vm2, %v2088_v7  ;;  %4470 = vmatmul.mubr.msk.bf16.vlgmr.msra.gmra.mrb[12].mxu1 %vm2147_vm2, %v2088_v7  ;;  %v5309_v7 = vld [vmem:[#allocation11 + $0x348] ss:$28 sps:$4 sm:$0xff]  }
 0x3a1   :  { %3708 = vmatpush1.bf16.msra.mxu0 %v5219_v5  ;;  %3794 = vmatpush1.bf16.msra.mxu1 %v5222_v6  ;;  %v5311_v5 = vld [vmem:[#allocation11 + $0x34c] ss:$28 sps:$4 sm:$0xff]   ;;  %v5314_v6 = vld [vmem:[#allocation11 + $0x354] ss:$28 sps:$4 sm:$0xff]  }
 0x3a2   :  { %3709 = vmatprep.subr.bf16.mxu0 %v5227_v8  ;;  %3795 = vmatprep.subr.bf16.mxu1 %v5230_v9  ;;  %v5312_v8 = vld [vmem:[#allocation11 + $0x350] ss:$28 sps:$4 sm:$0xff]   ;;  %v5317_v9 = vld [vmem:[#allocation11 + $0x384] ss:$28 sps:$4 sm:$0xff]  }
 0x3a5   :  { %3710 = vmatpush1.bf16.msra.mxu0 %v5225_v10  ;;  %3796 = vmatpush1.bf16.msra.mxu1 %v5228_v12  ;;  %v5320_v10 = vld [vmem:[#allocation11 + $0x38c] ss:$28 sps:$4 sm:$0xff]  }
 0x3a6   :  { %3711 = vmatprep.subr.bf16.mxu0 %v5233_v13  ;;  %3797 = vmatprep.subr.bf16.mxu1 %v5236_v14  ;;  %v2095_v12 = vld [vmem:[%s6068_s7] sm:$0xf] }
 0x3a7   :  { %v2100_v13 = vrot.slane %v2095_v12, %v5959_v31  ;;  %v2108_v14 = vrot.slane %v2095_v12, %v5962_v32 }
 0x3a9   :  { %3712 = vmatpush1.bf16.msra.mxu0 %v5231_v15  ;;  %3798 = vmatpush1.bf16.msra.mxu1 %v5234_v16  ;;  %v2104_v15 = vrot.slane %v2095_v12, %v5968_v34  ;;  %v2112_v16 = vrot.slane %v2095_v12, %v5971_v35  ;;  %v5359_v12 = vld [vmem:[#allocation11 + $0x50c] ss:$28 sps:$4 sm:$0xff]  }
 0x3aa   :  { %3713 = vmatprep.subr.bf16.mxu0 %v5239_v17  ;;  %3799 = vmatprep.subr.bf16.mxu1 %v5242_v18 }
 0x3ad   :  { %3714 = vmatpush1.bf16.msra.mxu0 %v5237_v19  ;;  %3800 = vmatpush1.bf16.msra.mxu1 %v5240_v20 }
 0x3ae   :  { %3715 = vmatprep.subr.bf16.mxu0 %v5245_v21  ;;  %3801 = vmatprep.subr.bf16.mxu1 %v5248_v22 }
 0x3b1   :  { %3716 = vmatpush1.bf16.msra.mxu0 %v5243_v23  ;;  %3802 = vmatpush1.bf16.msra.mxu1 %v5246_v24 }
 0x3b2   :  { %3717 = vmatprep.subr.bf16.mxu0 %v5251_v25  ;;  %3803 = vmatprep.subr.bf16.mxu1 %v5254_v26 }
 0x3b5   :  { %3718 = vmatpush1.bf16.msra.mxu0 %v5249_v27  ;;  %3804 = vmatpush1.bf16.msra.mxu1 %v5252_v28 }
 0x3b6   :  { %3719 = vmatprep.subr.bf16.mxu0 %v5257_v29  ;;  %3805 = vmatprep.subr.bf16.mxu1 %v5260_v33 }
 0x3b9   :  { %3720 = vmatpush1.bf16.msra.mxu0 %v5255_v36  ;;  %3806 = vmatpush1.bf16.msra.mxu1 %v5258_v37 }
 0x3ba   :  { %3721 = vmatprep.subr.bf16.mxu0 %v5263_v38  ;;  %3807 = vmatprep.subr.bf16.mxu1 %v5266_v39 }
 0x3bd   :  { %3722 = vmatpush1.bf16.msra.mxu0 %v5261_v40  ;;  %3808 = vmatpush1.bf16.msra.mxu1 %v5264_v11 }
 0x3be   :  { %3723 = vmatprep.subr.bf16.mxu0 %v5269_v41  ;;  %3809 = vmatprep.subr.bf16.mxu1 %v5272_v42 }
 0x3c1   :  { %3724 = vmatpush1.bf16.msra.mxu0 %v5267_v43  ;;  %3810 = vmatpush1.bf16.msra.mxu1 %v5270_v44 }
 0x3c2   :  { %3725 = vmatprep.subr.bf16.mxu0 %v5275_v45  ;;  %3811 = vmatprep.subr.bf16.mxu1 %v5278_v46 }
 0x3c5   :  { %3726 = vmatpush1.bf16.msra.mxu0 %v5273_v47  ;;  %3812 = vmatpush1.bf16.msra.mxu1 %v5276_v48 }
 0x3c6   :  { %3727 = vmatprep.subr.bf16.mxu0 %v5281_v49  ;;  %3813 = vmatprep.subr.bf16.mxu1 %v5284_v50  ;;  %v5315_v49 = vld [vmem:[#allocation11 + $0x380] ss:$28 sps:$4 sm:$0xff]   ;;  %v5318_v50 = vld [vmem:[#allocation11 + $0x388] ss:$28 sps:$4 sm:$0xff]  }
 0x3c9   :  { %3728 = vmatpush1.bf16.msra.mxu0 %v5279_v51  ;;  %3814 = vmatpush1.bf16.msra.mxu1 %v5282_v52  ;;  %v5323_v51 = vld [vmem:[#allocation11 + $0x3bc] ss:$28 sps:$4 sm:$0xff]   ;;  %v5326_v52 = vld [vmem:[#allocation11 + $0x3c4] ss:$28 sps:$4 sm:$0xff]  }
 0x3ca   :  { %3729 = vmatprep.subr.bf16.mxu0 %v5287_v53  ;;  %3815 = vmatprep.subr.bf16.mxu1 %v5290_v54  ;;  %v5321_v53 = vld [vmem:[#allocation11 + $0x3b8] ss:$28 sps:$4 sm:$0xff]   ;;  %v5324_v54 = vld [vmem:[#allocation11 + $0x3c0] ss:$28 sps:$4 sm:$0xff]  }
 0x3cd   :  { %3730 = vmatpush1.bf16.msra.mxu0 %v5285_v55  ;;  %3816 = vmatpush1.bf16.msra.mxu1 %v5288_v56  ;;  %v5329_v55 = vld [vmem:[#allocation11 + $0x3f4] ss:$28 sps:$4 sm:$0xff]   ;;  %v5332_v56 = vld [vmem:[#allocation11 + $0x3fc] ss:$28 sps:$4 sm:$0xff]  }
 0x3ce   :  { %3731 = vmatprep.subr.bf16.mxu0 %v5293_v57  ;;  %3817 = vmatprep.subr.bf16.mxu1 %v5296_v58  ;;  %v5327_v57 = vld [vmem:[#allocation11 + $0x3f0] ss:$28 sps:$4 sm:$0xff]   ;;  %v5330_v58 = vld [vmem:[#allocation11 + $0x3f8] ss:$28 sps:$4 sm:$0xff]  }
 0x3d1   :  { %3732 = vmatpush1.bf16.msra.mxu0 %v5291_v59  ;;  %3818 = vmatpush1.bf16.msra.mxu1 %v5294_v60  ;;  %v5335_v59 = vld [vmem:[#allocation11 + $0x42c] ss:$28 sps:$4 sm:$0xff]   ;;  %v5338_v60 = vld [vmem:[#allocation11 + $0x434] ss:$28 sps:$4 sm:$0xff]  }
 0x3d2   :  { %3733 = vmatprep.subr.bf16.mxu0 %v5299_v61  ;;  %3819 = vmatprep.subr.bf16.mxu1 %v5302_v62  ;;  %v5333_v61 = vld [vmem:[#allocation11 + $0x428] ss:$28 sps:$4 sm:$0xff]   ;;  %v5336_v62 = vld [vmem:[#allocation11 + $0x430] ss:$28 sps:$4 sm:$0xff]  }
 0x3d5   :  { %3734 = vmatpush1.bf16.msra.mxu0 %v5297_v63  ;;  %3820 = vmatpush1.bf16.msra.mxu1 %v5300_v0  ;;  %v5341_v63 = vld [vmem:[#allocation11 + $0x464] ss:$28 sps:$4 sm:$0xff]   ;;  %v5344_v0 = vld [vmem:[#allocation11 + $0x46c] ss:$28 sps:$4 sm:$0xff]  }
 0x3d6   :  { %3735 = vmatprep.subr.bf16.mxu0 %v5305_v1  ;;  %3821 = vmatprep.subr.bf16.mxu1 %v5308_v2  ;;  %v5339_v1 = vld [vmem:[#allocation11 + $0x460] ss:$28 sps:$4 sm:$0xff]   ;;  %v5342_v2 = vld [vmem:[#allocation11 + $0x468] ss:$28 sps:$4 sm:$0xff]  }
 0x3d9   :  { %3736 = vmatpush1.bf16.msra.mxu0 %v5303_v3  ;;  %3822 = vmatpush1.bf16.msra.mxu1 %v5306_v4  ;;  %v5347_v3 = vld [vmem:[#allocation11 + $0x49c] ss:$28 sps:$4 sm:$0xff]   ;;  %v5350_v4 = vld [vmem:[#allocation11 + $0x4a4] ss:$28 sps:$4 sm:$0xff]  }
 0x3da   :  { %3737 = vmatprep.subr.bf16.mxu0 %v5311_v5  ;;  %3823 = vmatprep.subr.bf16.mxu1 %v5314_v6  ;;  %v5345_v5 = vld [vmem:[#allocation11 + $0x498] ss:$28 sps:$4 sm:$0xff]   ;;  %v5348_v6 = vld [vmem:[#allocation11 + $0x4a0] ss:$28 sps:$4 sm:$0xff]  }
 0x3dd   :  { %3738 = vmatpush1.bf16.msra.mxu0 %v5309_v7  ;;  %3824 = vmatpush1.bf16.msra.mxu1 %v5312_v8  ;;  %v5353_v7 = vld [vmem:[#allocation11 + $0x4d4] ss:$28 sps:$4 sm:$0xff]   ;;  %v5356_v8 = vld [vmem:[#allocation11 + $0x4dc] ss:$28 sps:$4 sm:$0xff]  }
 0x3de   :  { %3750 = vmatprep.subr.bf16.mxu0 %v5317_v9  ;;  %3836 = vmatprep.subr.bf16.mxu1 %v5320_v10  ;;  %v5351_v9 = vld [vmem:[#allocation11 + $0x4d0] ss:$28 sps:$4 sm:$0xff]   ;;  %v5354_v10 = vld [vmem:[#allocation11 + $0x4d8] ss:$28 sps:$4 sm:$0xff]  }
 0x473   :  { %v2198_v17 = vpop.f32.mrb[4].mxu0  ;;  %v2241_v18 = vpop.f32.mrb[12].mxu1 }
 0x474   :  { %v2199_v19 = vadd.f32 %v2198_v17, %v2100_v13  ;;  %v2242_v20 = vadd.f32 %v2241_v18, %v2108_v14  ;;  %v2200_v21 = vpop.f32.mrb[5].mxu0  ;;  %v2243_v22 = vpop.f32.mrb[13].mxu1  ;;  %v5368_v17 = vld [vmem:[#allocation11 + $0x54c] ss:$28 sps:$4 sm:$0xff]   ;;  %v5363_v18 = vld [vmem:[#allocation11 + $0x540] ss:$28 sps:$4 sm:$0xff]  }
 0x475   :  { %v2201_v23 = vadd.f32 %v2200_v21, %v2104_v15  ;;  %v2244_v24 = vadd.f32 %v2243_v22, %v2112_v16  ;;  %v2202_v25 = vpop.f32.mrb[6].mxu0  ;;  %v2245_v26 = vpop.f32.mrb[14].mxu1  ;;  %v5374_v21 = vld [vmem:[#allocation11 + $0x584] ss:$28 sps:$4 sm:$0xff]   ;;  %v5369_v22 = vld [vmem:[#allocation11 + $0x578] ss:$28 sps:$4 sm:$0xff]  }
 0x476   :  { %v2203_v27 = vadd.f32 %v2202_v25, %v2100_v13  ;;  %v2246_v28 = vadd.f32 %v2245_v26, %v2108_v14  ;;  %v2204_v29 = vpop.f32.mrb[7].mxu0  ;;  %v2247_v33 = vpop.f32.mrb[15].mxu1  ;;  %v2250_v38 = vmax.f32 %v2199_v19, 0.0  ;;  %v2252_v39 = vmax.f32 %v2242_v20, 0.0  ;;  %v5362_v13 = vld [vmem:[#allocation11 + $0x514] ss:$28 sps:$4 sm:$0xff]  }
 0x477   :  { %v2205_v36 = vadd.f32 %v2204_v29, %v2104_v15  ;;  %v2248_v37 = vadd.f32 %v2247_v33, %v2112_v16  ;;  %v2251_v41 = vmax.f32 %v2201_v23, 0.0  ;;  %v2253_v42 = vmax.f32 %v2244_v24, 0.0  ;;  %v5357_v14 = vld [vmem:[#allocation11 + $0x508] ss:$28 sps:$4 sm:$0xff]   ;;  %v5360_v15 = vld [vmem:[#allocation11 + $0x510] ss:$28 sps:$4 sm:$0xff]  }
 0x478   :  { %v2254_v40 = vmax.f32 %v2203_v27, 0.0  ;;  %v2256_v11 = vmax.f32 %v2246_v28, 0.0  ;;  %v5365_v16 = vld [vmem:[#allocation11 + $0x544] ss:$28 sps:$4 sm:$0xff]   ;;  %v5371_v20 = vld [vmem:[#allocation11 + $0x57c] ss:$28 sps:$4 sm:$0xff]  }
 0x479   :  { %v2255_v43 = vmax.f32 %v2205_v36, 0.0  ;;  %v2257_v44 = vmax.f32 %v2248_v37, 0.0  ;;  %v5366_v19 = vld [vmem:[#allocation11 + $0x548] ss:$28 sps:$4 sm:$0xff]   ;;  %v5372_v23 = vld [vmem:[#allocation11 + $0x580] ss:$28 sps:$4 sm:$0xff]  }
 0x47a   :  { %v5988_v45 = vpack.c.bf16 %v2254_v40, %v2250_v38  ;;  %v5990_v46 = vpack.c.bf16 %v2256_v11, %v2252_v39  ;;  %v5377_v24 = vld [vmem:[#allocation11 + $0x5b4] ss:$28 sps:$4 sm:$0xff]   ;;  %v5380_v25 = vld [vmem:[#allocation11 + $0x5bc] ss:$28 sps:$4 sm:$0xff]   ;;  %v5383_v28 = vld [vmem:[#allocation11 + $0x5ec] ss:$28 sps:$4 sm:$0xff]  }
 0x47b   :  { %v5992_v47 = vpack.c.bf16 %v2255_v43, %v2251_v41  ;;  %v5994_v48 = vpack.c.bf16 %v2257_v44, %v2253_v42  ;;  %v5375_v26 = vld [vmem:[#allocation11 + $0x5b0] ss:$28 sps:$4 sm:$0xff]   ;;  %v5378_v27 = vld [vmem:[#allocation11 + $0x5b8] ss:$28 sps:$4 sm:$0xff]   ;;  %v5381_v33 = vld [vmem:[#allocation11 + $0x5e8] ss:$28 sps:$4 sm:$0xff]  }
 0x47c   :  { %v5386_v29 = vld [vmem:[#allocation11 + $0x5f4] ss:$28 sps:$4 sm:$0xff]   ;;  %v5389_v37 = vld [vmem:[#allocation11 + $0x624] ss:$28 sps:$4 sm:$0xff]   ;;  %v5392_v38 = vld [vmem:[#allocation11 + $0x62c] ss:$28 sps:$4 sm:$0xff]  }
 0x47d   :  { %3739 = vmatprep.mubr.bf16.mxu0 %v5992_v47  ;;  %3825 = vmatprep.mubr.bf16.mxu1 %v5992_v47  ;;  %v5384_v36 = vld [vmem:[#allocation11 + $0x5f0] ss:$28 sps:$4 sm:$0xff]   ;;  %v5387_v39 = vld [vmem:[#allocation11 + $0x620] ss:$28 sps:$4 sm:$0xff]   ;;  %v5390_v40 = vld [vmem:[#allocation11 + $0x628] ss:$28 sps:$4 sm:$0xff]  }
 0x47e   :  { %3740 = vmatmul.mubr.bf16.vlgmr.msra.gmra.mrb[8].mxu0 %v5988_v45  ;;  %3826 = vmatmul.mubr.bf16.vlgmr.msra.gmra.mrb[16].mxu1 %v5988_v45  ;;  %v5395_v11 = vld [vmem:[#allocation11 + $0x65c] ss:$28 sps:$4 sm:$0xff]   ;;  %v5398_v41 = vld [vmem:[#allocation11 + $0x664] ss:$28 sps:$4 sm:$0xff]   ;;  %v5401_v44 = vld [vmem:[#allocation11 + $0x694] ss:$28 sps:$4 sm:$0xff]  }
 0x47f   :  { %3751 = vmatpush1.bf16.msra.mxu0 %v5315_v49  ;;  %3837 = vmatpush1.bf16.msra.mxu1 %v5318_v50  ;;  %v5393_v42 = vld [vmem:[#allocation11 + $0x658] ss:$28 sps:$4 sm:$0xff]   ;;  %v5396_v43 = vld [vmem:[#allocation11 + $0x660] ss:$28 sps:$4 sm:$0xff]   ;;  %v5399_v50 = vld [vmem:[#allocation11 + $0x690] ss:$28 sps:$4 sm:$0xff]  }
 0x480   :  { %3782 = vmatprep.mubr.bf16.mxu0 %v5994_v48  ;;  %3868 = vmatprep.mubr.bf16.mxu1 %v5994_v48  ;;  %v5404_v49 = vld [vmem:[#allocation11 + $0x69c] ss:$28 sps:$4 sm:$0xff]  }
 0x481   :  { %3752 = vmatprep.subr.bf16.mxu0 %v5323_v51  ;;  %3838 = vmatprep.subr.bf16.mxu1 %v5326_v52  ;;  %v5402_v51 = vld [vmem:[#allocation11 + $0x698] ss:$28 sps:$4 sm:$0xff]   ;;  %v5407_v52 = vld [vmem:[#allocation11 + $0x6cc] ss:$28 sps:$4 sm:$0xff]  }
 0x483   :  { %3753 = vmatpush1.bf16.msra.mxu0 %v5321_v53  ;;  %3839 = vmatpush1.bf16.msra.mxu1 %v5324_v54  ;;  %v5410_v53 = vld [vmem:[#allocation11 + $0x6d4] ss:$28 sps:$4 sm:$0xff]   ;;  %v5405_v54 = vld [vmem:[#allocation11 + $0x6c8] ss:$28 sps:$4 sm:$0xff]  }
 0x484   :  { %3754 = vmatprep.subr.bf16.mxu0 %v5329_v55  ;;  %3840 = vmatprep.subr.bf16.mxu1 %v5332_v56  ;;  %v5408_v55 = vld [vmem:[#allocation11 + $0x6d0] ss:$28 sps:$4 sm:$0xff]  }
 0x485   :  { %v5413_v56 = vld [vmem:[#allocation11 + $0x14] ss:$28 sps:$4 sm:$0xff]  }
 0x487   :  { %3755 = vmatpush1.bf16.msra.mxu0 %v5327_v57  ;;  %3841 = vmatpush1.bf16.msra.mxu1 %v5330_v58  ;;  %v5414_v57 = vld [vmem:[#allocation11 + $0x1d8] ss:$28 sps:$4 sm:$0xff]   ;;  %v5411_v58 = vld [vmem:[#allocation11 + $0x10] ss:$28 sps:$4 sm:$0xff]  }
 0x488   :  { %3756 = vmatprep.subr.bf16.mxu0 %v5335_v59  ;;  %3842 = vmatprep.subr.bf16.mxu1 %v5338_v60  ;;  %v5415_v59 = vld [vmem:[#allocation11 + $0x18] ss:$28 sps:$4 sm:$0xff]   ;;  %v5418_v60 = vld [vmem:[#allocation11 + $0x4c] ss:$28 sps:$4 sm:$0xff]  }
 0x48b   :  { %3757 = vmatpush1.bf16.msra.mxu0 %v5333_v61  ;;  %3843 = vmatpush1.bf16.msra.mxu1 %v5336_v62  ;;  %v5419_v61 = vld [vmem:[#allocation11 + $0x210] ss:$28 sps:$4 sm:$0xff]   ;;  %v5416_v62 = vld [vmem:[#allocation11 + $0x48] ss:$28 sps:$4 sm:$0xff]  }
 0x48c   :  { %3758 = vmatprep.subr.bf16.mxu0 %v5341_v63  ;;  %3844 = vmatprep.subr.bf16.mxu1 %v5344_v0  ;;  %v5420_v63 = vld [vmem:[#allocation11 + $0x50] ss:$28 sps:$4 sm:$0xff]   ;;  %v5423_v0 = vld [vmem:[#allocation11 + $0x84] ss:$28 sps:$4 sm:$0xff]  }
 0x48f   :  { %3759 = vmatpush1.bf16.msra.mxu0 %v5339_v1  ;;  %3845 = vmatpush1.bf16.msra.mxu1 %v5342_v2  ;;  %v5424_v1 = vld [vmem:[#allocation11 + $0x248] ss:$28 sps:$4 sm:$0xff]   ;;  %v5421_v2 = vld [vmem:[#allocation11 + $0x80] ss:$28 sps:$4 sm:$0xff]  }
 0x490   :  { %3760 = vmatprep.subr.bf16.mxu0 %v5347_v3  ;;  %3846 = vmatprep.subr.bf16.mxu1 %v5350_v4  ;;  %v5425_v3 = vld [vmem:[#allocation11 + $0x88] ss:$28 sps:$4 sm:$0xff]   ;;  %v5428_v4 = vld [vmem:[#allocation11 + $0xbc] ss:$28 sps:$4 sm:$0xff]  }
 0x493   :  { %3761 = vmatpush1.bf16.msra.mxu0 %v5345_v5  ;;  %3847 = vmatpush1.bf16.msra.mxu1 %v5348_v6  ;;  %v5429_v5 = vld [vmem:[#allocation11 + $0x280] ss:$28 sps:$4 sm:$0xff]   ;;  %v5426_v6 = vld [vmem:[#allocation11 + $0xb8] ss:$28 sps:$4 sm:$0xff]  }
 0x494   :  { %3762 = vmatprep.subr.bf16.mxu0 %v5353_v7  ;;  %3848 = vmatprep.subr.bf16.mxu1 %v5356_v8  ;;  %v5430_v7 = vld [vmem:[#allocation11 + $0xc0] ss:$28 sps:$4 sm:$0xff]   ;;  %v5433_v8 = vld [vmem:[#allocation11 + $0xf4] ss:$28 sps:$4 sm:$0xff]  }
 0x497   :  { %3763 = vmatpush1.bf16.msra.mxu0 %v5351_v9  ;;  %3849 = vmatpush1.bf16.msra.mxu1 %v5354_v10  ;;  %v5431_v9 = vld [vmem:[#allocation11 + $0xf0] ss:$28 sps:$4 sm:$0xff]   ;;  %v5435_v10 = vld [vmem:[#allocation11 + $0xf8] ss:$28 sps:$4 sm:$0xff]  }
 0x498   :  { %3764 = vmatprep.subr.bf16.mxu0 %v5359_v12  ;;  %3850 = vmatprep.subr.bf16.mxu1 %v5362_v13  ;;  %v5438_v12 = vld [vmem:[#allocation11 + $0x12c] ss:$28 sps:$4 sm:$0xff]  }
 0x499   :  { %v5439_v13 = vld [vmem:[#allocation11 + $0x2f0] ss:$28 sps:$4 sm:$0xff]  }
 0x49b   :  { %3765 = vmatpush1.bf16.msra.mxu0 %v5357_v14  ;;  %3851 = vmatpush1.bf16.msra.mxu1 %v5360_v15  ;;  %v5436_v14 = vld [vmem:[#allocation11 + $0x128] ss:$28 sps:$4 sm:$0xff]   ;;  %v5440_v15 = vld [vmem:[#allocation11 + $0x130] ss:$28 sps:$4 sm:$0xff]  }
 0x49c   :  { %3766 = vmatprep.subr.bf16.mxu0 %v5365_v16  ;;  %3852 = vmatprep.subr.bf16.mxu1 %v5368_v17  ;;  %v5443_v16 = vld [vmem:[#allocation11 + $0x164] ss:$28 sps:$4 sm:$0xff]  }
 0x49d   :  { %v5444_v17 = vld [vmem:[#allocation11 + $0x328] ss:$28 sps:$4 sm:$0xff]  }
 0x49f   :  { %3767 = vmatpush1.bf16.msra.mxu0 %v5363_v18  ;;  %3853 = vmatpush1.bf16.msra.mxu1 %v5366_v19  ;;  %v5441_v18 = vld [vmem:[#allocation11 + $0x160] ss:$28 sps:$4 sm:$0xff]   ;;  %v5445_v19 = vld [vmem:[#allocation11 + $0x168] ss:$28 sps:$4 sm:$0xff]  }
 0x4a0   :  { %3768 = vmatprep.subr.bf16.mxu0 %v5371_v20  ;;  %3854 = vmatprep.subr.bf16.mxu1 %v5374_v21  ;;  %v5448_v20 = vld [vmem:[#allocation11 + $0x19c] ss:$28 sps:$4 sm:$0xff]  }
 0x4a1   :  { %v5449_v21 = vld [vmem:[#allocation11 + $0x360] ss:$28 sps:$4 sm:$0xff]  }
 0x4a3   :  { %3769 = vmatpush1.bf16.msra.mxu0 %v5369_v22  ;;  %3855 = vmatpush1.bf16.msra.mxu1 %v5372_v23  ;;  %v5446_v22 = vld [vmem:[#allocation11 + $0x198] ss:$28 sps:$4 sm:$0xff]   ;;  %v5450_v23 = vld [vmem:[#allocation11 + $0x1a0] ss:$28 sps:$4 sm:$0xff]  }
 0x4a4   :  { %3770 = vmatprep.subr.bf16.mxu0 %v5377_v24  ;;  %3856 = vmatprep.subr.bf16.mxu1 %v5380_v25  ;;  %v5453_v24 = vld [vmem:[#allocation11 + $0x1d4] ss:$28 sps:$4 sm:$0xff]  }
 0x4a5   :  { %v5454_v25 = vld [vmem:[#allocation11 + $0x558] ss:$28 sps:$4 sm:$0xff]  }
 0x4a7   :  { %3771 = vmatpush1.bf16.msra.mxu0 %v5375_v26  ;;  %3857 = vmatpush1.bf16.msra.mxu1 %v5378_v27  ;;  %v5451_v26 = vld [vmem:[#allocation11 + $0x1d0] ss:$28 sps:$4 sm:$0xff]   ;;  %v5455_v27 = vld [vmem:[#allocation11 + $0x398] ss:$28 sps:$4 sm:$0xff]  }
 0x4a8   :  { %3772 = vmatprep.subr.bf16.mxu0 %v5383_v28  ;;  %3858 = vmatprep.subr.bf16.mxu1 %v5386_v29  ;;  %v5458_v28 = vld [vmem:[#allocation11 + $0x20c] ss:$28 sps:$4 sm:$0xff]  }
 0x4a9   :  { %v5459_v29 = vld [vmem:[#allocation11 + $0x590] ss:$28 sps:$4 sm:$0xff]  }
 0x4ab   :  { %3773 = vmatpush1.bf16.msra.mxu0 %v5381_v33  ;;  %3859 = vmatpush1.bf16.msra.mxu1 %v5384_v36  ;;  %v5456_v33 = vld [vmem:[#allocation11 + $0x208] ss:$28 sps:$4 sm:$0xff]   ;;  %v5460_v36 = vld [vmem:[#allocation11 + $0x3d0] ss:$28 sps:$4 sm:$0xff]  }
 0x4ac   :  { %3774 = vmatprep.subr.bf16.mxu0 %v5389_v37  ;;  %3860 = vmatprep.subr.bf16.mxu1 %v5392_v38  ;;  %v5463_v37 = vld [vmem:[#allocation11 + $0x244] ss:$28 sps:$4 sm:$0xff]  }
 0x4ad   :  { %v5464_v38 = vld [vmem:[#allocation11 + $0x5c8] ss:$28 sps:$4 sm:$0xff]  }
 0x4af   :  { %3775 = vmatpush1.bf16.msra.mxu0 %v5387_v39  ;;  %3861 = vmatpush1.bf16.msra.mxu1 %v5390_v40  ;;  %v5461_v39 = vld [vmem:[#allocation11 + $0x240] ss:$28 sps:$4 sm:$0xff]   ;;  %v5465_v40 = vld [vmem:[#allocation11 + $0x408] ss:$28 sps:$4 sm:$0xff]  }
 0x4b0   :  { %3776 = vmatprep.subr.bf16.mxu0 %v5395_v11  ;;  %3862 = vmatprep.subr.bf16.mxu1 %v5398_v41  ;;  %v5468_v11 = vld [vmem:[#allocation11 + $0x27c] ss:$28 sps:$4 sm:$0xff]  }
 0x4b1   :  { %v5469_v41 = vld [vmem:[#allocation11 + $0x600] ss:$28 sps:$4 sm:$0xff]  }
 0x4b3   :  { %3777 = vmatpush1.bf16.msra.mxu0 %v5393_v42  ;;  %3863 = vmatpush1.bf16.msra.mxu1 %v5396_v43  ;;  %v5466_v42 = vld [vmem:[#allocation11 + $0x278] ss:$28 sps:$4 sm:$0xff]   ;;  %v5470_v43 = vld [vmem:[#allocation11 + $0x440] ss:$28 sps:$4 sm:$0xff]  }
 0x4b4   :  { %3778 = vmatprep.subr.bf16.mxu0 %v5401_v44  ;;  %3864 = vmatprep.subr.bf16.mxu1 %v5404_v49  ;;  %v5473_v44 = vld [vmem:[#allocation11 + $0x2b4] ss:$28 sps:$4 sm:$0xff]  }
 0x4b5   :  { %v5474_v49 = vld [vmem:[#allocation11 + $0x638] ss:$28 sps:$4 sm:$0xff]  }
 0x4b7   :  { %3779 = vmatpush1.bf16.msra.mxu0 %v5399_v50  ;;  %3865 = vmatpush1.bf16.msra.mxu1 %v5402_v51  ;;  %v5471_v50 = vld [vmem:[#allocation11 + $0x2b0] ss:$28 sps:$4 sm:$0xff]   ;;  %v5475_v51 = vld [vmem:[#allocation11 + $0x478] ss:$28 sps:$4 sm:$0xff]  }
 0x4b8   :  { %3780 = vmatprep.subr.bf16.mxu0 %v5407_v52  ;;  %3866 = vmatprep.subr.bf16.mxu1 %v5410_v53  ;;  %v5478_v52 = vld [vmem:[#allocation11 + $0x2ec] ss:$28 sps:$4 sm:$0xff]  }
 0x4b9   :  { %v5479_v53 = vld [vmem:[#allocation11 + $0x670] ss:$28 sps:$4 sm:$0xff]  }
 0x4bb   :  { %3781 = vmatpush1.bf16.msra.mxu0 %v5405_v54  ;;  %3867 = vmatpush1.bf16.msra.mxu1 %v5408_v55  ;;  %v5476_v54 = vld [vmem:[#allocation11 + $0x2e8] ss:$28 sps:$4 sm:$0xff]   ;;  %v5480_v55 = vld [vmem:[#allocation11 + $0x4b0] ss:$28 sps:$4 sm:$0xff]  }
 0x4bc   :  { %3879 = vmatprep.subr.bf16.mxu0 %v5413_v56  ;;  %4755 = vmatprep.subr.bf16.mxu1 %v5414_v57  ;;  %v5483_v56 = vld [vmem:[#allocation11 + $0x324] ss:$28 sps:$4 sm:$0xff]  }
 0x4bd   :  { %v5484_v57 = vld [vmem:[#allocation11 + $0x6a8] ss:$28 sps:$4 sm:$0xff]  }
 0x4be   :  { %3783 = vmatmul.mubr.bf16.vlgmr.msra.gmra.mrb[8].mxu0 %v5990_v46  ;;  %3869 = vmatmul.mubr.bf16.vlgmr.msra.gmra.mrb[16].mxu1 %v5990_v46 }
 0x4bf   :  { %3880 = vmatpush1.bf16.msra.mxu0 %v5411_v58  ;;  %3911 = vmatprep.mubr.bf16.mxu0 %v5992_v47  ;;  %v5481_v58 = vld [vmem:[#allocation11 + $0x320] ss:$28 sps:$4 sm:$0xff]  }
 0x4c0   :  { %4756 = vmatpush3.bf16.msra.mxu1 %v5415_v59  ;;  %3997 = vmatprep.mubr.bf16.mxu1 %v5992_v47  ;;  %v5434_v47 = vld [vmem:[#allocation11 + $0x2b8] ss:$28 sps:$4 sm:$0xff]   ;;  %v5485_v59 = vld [vmem:[#allocation11 + $0x4e8] ss:$28 sps:$4 sm:$0xff]  }
 0x4c1   :  { %3881 = vmatprep.subr.bf16.mxu0 %v5418_v60  ;;  %4757 = vmatprep.subr.bf16.mxu1 %v5419_v61  ;;  %v5488_v60 = vld [vmem:[#allocation11 + $0x35c] ss:$28 sps:$4 sm:$0xff]  }
 0x4c2   :  { %v5489_v61 = vld [vmem:[#allocation11 + $0x6e0] ss:$28 sps:$4 sm:$0xff]  }
 0x4c3   :  { %3882 = vmatpush1.bf16.msra.mxu0 %v5416_v62  ;;  %v5486_v62 = vld [vmem:[#allocation11 + $0x358] ss:$28 sps:$4 sm:$0xff]  }
 0x4c4   :  { %4758 = vmatpush3.bf16.msra.mxu1 %v5420_v63  ;;  %3883 = vmatprep.subr.bf16.mxu0 %v5423_v0  ;;  %v5490_v63 = vld [vmem:[#allocation11 + $0x520] ss:$28 sps:$4 sm:$0xff]   ;;  %v5493_v0 = vld [vmem:[#allocation11 + $0x394] ss:$28 sps:$4 sm:$0xff]  }
 0x4c5   :  { %4759 = vmatprep.subr.bf16.mxu1 %v5424_v1  ;;  %v5491_v1 = vld [vmem:[#allocation11 + $0x390] ss:$28 sps:$4 sm:$0xff]  }
 0x4c7   :  { %3884 = vmatpush1.bf16.msra.mxu0 %v5421_v2  ;;  %v5496_v2 = vld [vmem:[#allocation11 + $0x3cc] ss:$28 sps:$4 sm:$0xff]  }
 0x4c8   :  { %4760 = vmatpush3.bf16.msra.mxu1 %v5425_v3  ;;  %3885 = vmatprep.subr.bf16.mxu0 %v5428_v4  ;;  %v5494_v3 = vld [vmem:[#allocation11 + $0x3c8] ss:$28 sps:$4 sm:$0xff]  }
 0x4c9   :  { %4761 = vmatprep.subr.bf16.mxu1 %v5429_v5  ;;  %v5499_v4 = vld [vmem:[#allocation11 + $0x404] ss:$28 sps:$4 sm:$0xff]  }
 0x4ca   :  { %v5497_v5 = vld [vmem:[#allocation11 + $0x400] ss:$28 sps:$4 sm:$0xff]  }
 0x4cb   :  { %3886 = vmatpush1.bf16.msra.mxu0 %v5426_v6  ;;  %v5502_v6 = vld [vmem:[#allocation11 + $0x43c] ss:$28 sps:$4 sm:$0xff]  }
 0x4cc   :  { %4762 = vmatpush3.bf16.msra.mxu1 %v5430_v7  ;;  %3887 = vmatprep.subr.bf16.mxu0 %v5433_v8  ;;  %v5500_v7 = vld [vmem:[#allocation11 + $0x438] ss:$28 sps:$4 sm:$0xff]  }
 0x4cd   :  { %4763 = vmatprep.subr.bf16.mxu1 %v5434_v47  ;;  %v5505_v8 = vld [vmem:[#allocation11 + $0x474] ss:$28 sps:$4 sm:$0xff]  }
 0x4ce   :  { %v5503_v47 = vld [vmem:[#allocation11 + $0x470] ss:$28 sps:$4 sm:$0xff]  }
 0x4cf   :  { %3888 = vmatpush1.bf16.msra.mxu0 %v5431_v9  ;;  %v5506_v9 = vld [vmem:[#allocation11 + $0x4a8] ss:$28 sps:$4 sm:$0xff]  }
 0x4d0   :  { %4764 = vmatpush3.bf16.msra.mxu1 %v5435_v10  ;;  %3889 = vmatprep.subr.bf16.mxu0 %v5438_v12  ;;  %v5511_v10 = vld [vmem:[#allocation11 + $0x4e4] ss:$28 sps:$4 sm:$0xff]   ;;  %v5514_v12 = vld [vmem:[#allocation11 + $0x51c] ss:$28 sps:$4 sm:$0xff]  }
 0x4d1   :  { %4765 = vmatprep.subr.bf16.mxu1 %v5439_v13  ;;  %v5512_v13 = vld [vmem:[#allocation11 + $0x518] ss:$28 sps:$4 sm:$0xff]  }
 0x4d3   :  { %3890 = vmatpush1.bf16.msra.mxu0 %v5436_v14  ;;  %v5517_v14 = vld [vmem:[#allocation11 + $0x554] ss:$28 sps:$4 sm:$0xff]  }
 0x4d4   :  { %4766 = vmatpush3.bf16.msra.mxu1 %v5440_v15  ;;  %3891 = vmatprep.subr.bf16.mxu0 %v5443_v16  ;;  %v5515_v15 = vld [vmem:[#allocation11 + $0x550] ss:$28 sps:$4 sm:$0xff]  }
 0x4d5   :  { %4767 = vmatprep.subr.bf16.mxu1 %v5444_v17  ;;  %v5520_v16 = vld [vmem:[#allocation11 + $0x58c] ss:$28 sps:$4 sm:$0xff]  }
 0x4d6   :  { %v5518_v17 = vld [vmem:[#allocation11 + $0x588] ss:$28 sps:$4 sm:$0xff]  }
 0x4d7   :  { %3892 = vmatpush1.bf16.msra.mxu0 %v5441_v18  ;;  %v5523_v18 = vld [vmem:[#allocation11 + $0x5c4] ss:$28 sps:$4 sm:$0xff]  }
 0x4d8   :  { %4768 = vmatpush3.bf16.msra.mxu1 %v5445_v19  ;;  %3893 = vmatprep.subr.bf16.mxu0 %v5448_v20  ;;  %v5521_v19 = vld [vmem:[#allocation11 + $0x5c0] ss:$28 sps:$4 sm:$0xff]  }
 0x4d9   :  { %4769 = vmatprep.subr.bf16.mxu1 %v5449_v21  ;;  %v5526_v20 = vld [vmem:[#allocation11 + $0x5fc] ss:$28 sps:$4 sm:$0xff]  }
 0x4da   :  { %v5524_v21 = vld [vmem:[#allocation11 + $0x5f8] ss:$28 sps:$4 sm:$0xff]  }
 0x4db   :  { %3894 = vmatpush1.bf16.msra.mxu0 %v5446_v22  ;;  %v5529_v22 = vld [vmem:[#allocation11 + $0x634] ss:$28 sps:$4 sm:$0xff]  }
 0x4dc   :  { %4770 = vmatpush3.bf16.msra.mxu1 %v5450_v23  ;;  %3895 = vmatprep.subr.bf16.mxu0 %v5453_v24  ;;  %v5527_v23 = vld [vmem:[#allocation11 + $0x630] ss:$28 sps:$4 sm:$0xff]  }
 0x4dd   :  { %4777 = vmatprep.subr.bf16.mxu1 %v5454_v25  ;;  %v5532_v24 = vld [vmem:[#allocation11 + $0x66c] ss:$28 sps:$4 sm:$0xff]  }
 0x4de   :  { %v5530_v25 = vld [vmem:[#allocation11 + $0x668] ss:$28 sps:$4 sm:$0xff]  }
 0x4df   :  { %3998 = vmatmul.mubr.bf16.vlgmr.msra.gmra.mrb[20].mxu1 %v5988_v45  ;;  %3896 = vmatpush1.bf16.msra.mxu0 %v5451_v26  ;;  %v5535_v26 = vld [vmem:[#allocation11 + $0x6a4] ss:$28 sps:$4 sm:$0xff]  }
 0x4e0   :  { %4778 = vmatpush3.bf16.msra.mxu1 %v5455_v27  ;;  %4038 = vmatprep.mubr.bf16.mxu1 %v5994_v48  ;;  %v5533_v27 = vld [vmem:[#allocation11 + $0x6a0] ss:$28 sps:$4 sm:$0xff]  }
 0x4e1   :  { %3897 = vmatprep.subr.bf16.mxu0 %v5458_v28  ;;  %4779 = vmatprep.subr.bf16.mxu1 %v5459_v29  ;;  %v5538_v28 = vld [vmem:[#allocation11 + $0x6dc] ss:$28 sps:$4 sm:$0xff]  }
 0x4e2   :  { %v5536_v29 = vld [vmem:[#allocation11 + $0x6d8] ss:$28 sps:$4 sm:$0xff]  }
 0x4e3   :  { %3898 = vmatpush1.bf16.msra.mxu0 %v5456_v33  ;;  %v6015_v33 = vld [vmem:[%s6070_s9] sm:$0xff]  ;;  %s5803_s9 = smov [#allocation14]  }
 0x4e4   :  { %4780 = vmatpush3.bf16.msra.mxu1 %v5460_v36  ;;  %3899 = vmatprep.subr.bf16.mxu0 %v5463_v37  ;;  %v2523_v36 = vrot.slane %v6015_v33, %v5959_v31  ;;  %v2531_v37 = vrot.slane %v6015_v33, %v5962_v32  ;;  %s4202_s29 = sshll.u32 %s5803_s9, 4  ;;  %s4203_s29 = int_to_ptr.vmem [resolvable:$true] %s4202_s29 }
 0x4e5   :  { %4781 = vmatprep.subr.bf16.mxu1 %v5464_v38  ;;  %v2527_v38 = vrot.slane %v6015_v33, %v5968_v34  ;;  %s5731_s30 = scalar_lea.vmem %s4203_s29, 256  ;;  %p5736_p7 = scmp.lt.s32.totalorder %s4203_s29, %s4203_s29 }
 0x4e6   :  { %p5732_p6 = scmp.ne.s32.totalorder %s4203_s29, %s5731_s30  ;;  %p5737_p8 = scmp.lt.s32.totalorder %s5731_s30, %s5731_s30 }
 0x4e7   :  { %3900 = vmatpush1.bf16.msra.mxu0 %v5461_v39  ;;  %v2535_v39 = vrot.slane %v6015_v33, %v5971_v35 }
 0x4e8   :  { %4782 = vmatpush3.bf16.msra.mxu1 %v5465_v40  ;;  %3901 = vmatprep.subr.bf16.mxu0 %v5468_v11  ;;  %p5738_p9 = por %p5737_p8, %p5736_p7 }
 0x4e9   :  { %4783 = vmatprep.subr.bf16.mxu1 %v5469_v41 }
 0x4ea   :  { %p5739_p10 = pnand %p5738_p9, %p5732_p6 }
 0x4eb   :  { %3902 = vmatpush1.bf16.msra.mxu0 %v5466_v42 }
 0x4ec   :  { %4784 = vmatpush3.bf16.msra.mxu1 %v5470_v43  ;;  %3903 = vmatprep.subr.bf16.mxu0 %v5473_v44 }
 0x4ed   :  { %4785 = vmatprep.subr.bf16.mxu1 %v5474_v49 }
 0x4ef   :  { %3904 = vmatpush1.bf16.msra.mxu0 %v5471_v50 }
 0x4f0   :  { %4786 = vmatpush3.bf16.msra.mxu1 %v5475_v51  ;;  %3905 = vmatprep.subr.bf16.mxu0 %v5478_v52 }
 0x4f1   :  { %4787 = vmatprep.subr.bf16.mxu1 %v5479_v53 }
 0x4f3   :  { %3906 = vmatpush1.bf16.msra.mxu0 %v5476_v54 }
 0x4f4   :  { %4788 = vmatpush3.bf16.msra.mxu1 %v5480_v55  ;;  %3907 = vmatprep.subr.bf16.mxu0 %v5483_v56 }
 0x4f5   :  { %4789 = vmatprep.subr.bf16.mxu1 %v5484_v57 }
 0x4f7   :  { %3908 = vmatpush1.bf16.msra.mxu0 %v5481_v58 }
 0x4f8   :  { %4790 = vmatpush3.bf16.msra.mxu1 %v5485_v59  ;;  %3909 = vmatprep.subr.bf16.mxu0 %v5488_v60 }
 0x4f9   :  { %4791 = vmatprep.subr.bf16.mxu1 %v5489_v61 }
 0x4fb   :  { %3910 = vmatpush1.bf16.msra.mxu0 %v5486_v62 }
 0x4fc   :  { %4792 = vmatpush3.bf16.msra.mxu1 %v5490_v63  ;;  %3922 = vmatprep.subr.bf16.mxu0 %v5493_v0 }
 0x4fe   :  { %3912 = vmatmul.mubr.bf16.vlgmr.msra.gmra.mrb[12].mxu0 %v5988_v45  ;;  %v5508_v45 = vld [vmem:[#allocation11 + $0x4ac] ss:$28 sps:$4 sm:$0xff]  }
 0x4ff   :  { %4039 = vmatmul.mubr.bf16.vlgmr.msra.gmra.mrb[24].mxu1 %v5990_v46  ;;  %3923 = vmatpush1.bf16.msra.mxu0 %v5491_v1 }
 0x500   :  { %3954 = vmatprep.mubr.bf16.mxu0 %v5994_v48  ;;  %3924 = vmatprep.subr.bf16.mxu0 %v5496_v2  ;;  %v5509_v48 = vld [vmem:[#allocation11 + $0x4e0] ss:$28 sps:$4 sm:$0xff]  }
 0x503   :  { %3925 = vmatpush1.bf16.msra.mxu0 %v5494_v3 }
 0x504   :  { %3926 = vmatprep.subr.bf16.mxu0 %v5499_v4 }
 0x507   :  { %3927 = vmatpush1.bf16.msra.mxu0 %v5497_v5 }
 0x508   :  { %3928 = vmatprep.subr.bf16.mxu0 %v5502_v6 }
 0x50b   :  { %3929 = vmatpush1.bf16.msra.mxu0 %v5500_v7 }
 0x50c   :  { %3930 = vmatprep.subr.bf16.mxu0 %v5505_v8 }
 0x50f   :  { %3931 = vmatpush1.bf16.msra.mxu0 %v5503_v47 }
 0x510   :  { %3932 = vmatprep.subr.bf16.mxu0 %v5508_v45 }
 0x513   :  { %3933 = vmatpush1.bf16.msra.mxu0 %v5506_v9 }
 0x514   :  { %3934 = vmatprep.subr.bf16.mxu0 %v5511_v10 }
 0x517   :  { %3935 = vmatpush1.bf16.msra.mxu0 %v5509_v48 }
 0x518   :  { %3936 = vmatprep.subr.bf16.mxu0 %v5514_v12 }
 0x51b   :  { %3937 = vmatpush1.bf16.msra.mxu0 %v5512_v13 }
 0x51c   :  { %3938 = vmatprep.subr.bf16.mxu0 %v5517_v14 }
 0x51f   :  { %3939 = vmatpush1.bf16.msra.mxu0 %v5515_v15 }
 0x520   :  { %3940 = vmatprep.subr.bf16.mxu0 %v5520_v16 }
 0x523   :  { %3941 = vmatpush1.bf16.msra.mxu0 %v5518_v17 }
 0x524   :  { %3942 = vmatprep.subr.bf16.mxu0 %v5523_v18 }
 0x527   :  { %3943 = vmatpush1.bf16.msra.mxu0 %v5521_v19 }
 0x528   :  { %3944 = vmatprep.subr.bf16.mxu0 %v5526_v20 }
 0x52b   :  { %3945 = vmatpush1.bf16.msra.mxu0 %v5524_v21 }
 0x52c   :  { %3946 = vmatprep.subr.bf16.mxu0 %v5529_v22 }
 0x52f   :  { %3947 = vmatpush1.bf16.msra.mxu0 %v5527_v23 }
 0x530   :  { %3948 = vmatprep.subr.bf16.mxu0 %v5532_v24 }
 0x533   :  { %3949 = vmatpush1.bf16.msra.mxu0 %v5530_v25 }
 0x534   :  { %3950 = vmatprep.subr.bf16.mxu0 %v5535_v26 }
 0x537   :  { %3951 = vmatpush1.bf16.msra.mxu0 %v5533_v27 }
 0x538   :  { %3952 = vmatprep.subr.bf16.mxu0 %v5538_v28 }
 0x53b   :  { %3953 = vmatpush1.bf16.msra.mxu0 %v5536_v29 }
 0x53e   :  { %3955 = vmatmul.mubr.bf16.vlgmr.msra.gmra.mrb[12].mxu0 %v5990_v46 }
 0x591   :  { %v3784_v40 = vpop.f32.mrb[8].mxu0  ;;  %v3870_v11 = vpop.f32.mrb[16].mxu1 }
 0x592   :  { %v4807_v46 = vadd.f32 %v3784_v40, %v2523_v36  ;;  %v4811_v41 = vadd.f32 %v3870_v11, %v2531_v37  ;;  %v3786_v42 = vpop.f32.mrb[9].mxu0  ;;  %v3872_v43 = vpop.f32.mrb[17].mxu1 }
 0x593   :  { %v4808_v44 = vadd.f32 %v3786_v42, %v2527_v38  ;;  %v4812_v49 = vadd.f32 %v3872_v43, %v2535_v39  ;;  %v3788_v50 = vpop.f32.mrb[10].mxu0  ;;  %v3874_v51 = vpop.f32.mrb[18].mxu1 }
 0x594   :  { %v4047_v31 = vsub.f32 0.0, %v4807_v46  ;;  %v4049_v52 = vsub.f32 0.0, %v4811_v41  ;;  %v4809_v53 = vadd.f32 %v3788_v50, %v2523_v36  ;;  %v4813_v32 = vadd.f32 %v3874_v51, %v2531_v37  ;;  %v3790_v54 = vpop.f32.mrb[11].mxu0  ;;  %v3876_v55 = vpop.f32.mrb[19].mxu1 }
 0x595   :  { %v4048_v34 = vsub.f32 0.0, %v4808_v44  ;;  %v4050_v56 = vsub.f32 0.0, %v4812_v49  ;;  %v4810_v57 = vadd.f32 %v3790_v54, %v2527_v38  ;;  %v4814_v35 = vadd.f32 %v3876_v55, %v2535_v39 }
 0x596   :  { %v4061_v58 = vmul.f32 1.442695, %v4047_v31  ;;  %v4065_v59 = vmul.f32 1.442695, %v4049_v52  ;;  %v4054_v60 = vsub.f32 0.0, %v4809_v53  ;;  %v4056_v61 = vsub.f32 0.0, %v4813_v32 }
 0x597   :  { %v4063_v62 = vmul.f32 1.442695, %v4048_v34  ;;  %v4067_v63 = vmul.f32 1.442695, %v4050_v56  ;;  %v4055_v0 = vsub.f32 0.0, %v4810_v57  ;;  %v4057_v1 = vsub.f32 0.0, %v4814_v35 }
 0x598   :  { %5543 = vpow2.f32 %v4061_v58  ;;  %v4075_v2 = vmul.f32 1.442695, %v4054_v60  ;;  %v4079_v3 = vmul.f32 1.442695, %v4056_v61 }
 0x599   :  { %5545 = vpow2.f32 %v4065_v59  ;;  %v4077_v4 = vmul.f32 1.442695, %v4055_v0  ;;  %v4081_v5 = vmul.f32 1.442695, %v4057_v1 }
 0x59a   :  { %5547 = vpow2.f32 %v4063_v62 }
 0x59b   :  { %5549 = vpow2.f32 %v4067_v63 }
 0x59c   :  { %5551 = vpow2.f32 %v4075_v2 }
 0x59d   :  { %5553 = vpow2.f32 %v4079_v3 }
 0x59e   :  { %5555 = vpow2.f32 %v4077_v4 }
 0x59f   :  { %5557 = vpow2.f32 %v4081_v5 }
 0x5a2   :  { %v5544_v6 = vpop.eup %5543 }
 0x5a3   :  { %v5546_v7 = vpop.eup %5545  ;;  %v4089_v8 = vadd.f32 1.0, %v5544_v6 }
 0x5a4   :  { %v5548_v47 = vpop.eup %5547  ;;  %v4091_v45 = vadd.f32 1.0, %v5546_v7 }
 0x5a5   :  { %v5550_v9 = vpop.eup %5549  ;;  %5559 = vrcp.f32 %v4089_v8  ;;  %v4090_v10 = vadd.f32 1.0, %v5548_v47 }
 0x5a6   :  { %v5552_v48 = vpop.eup %5551  ;;  %5561 = vrcp.f32 %v4091_v45  ;;  %v4092_v12 = vadd.f32 1.0, %v5550_v9 }
 0x5a7   :  { %v5554_v13 = vpop.eup %5553  ;;  %5563 = vrcp.f32 %v4090_v10  ;;  %v4096_v14 = vadd.f32 1.0, %v5552_v48 }
 0x5a8   :  { %v5556_v15 = vpop.eup %5555  ;;  %5565 = vrcp.f32 %v4092_v12  ;;  %v4098_v16 = vadd.f32 1.0, %v5554_v13 }
 0x5a9   :  { %v5558_v17 = vpop.eup %5557  ;;  %5567 = vrcp.f32 %v4096_v14  ;;  %v4097_v18 = vadd.f32 1.0, %v5556_v15 }
 0x5aa   :  { %5569 = vrcp.f32 %v4098_v16  ;;  %v4099_v19 = vadd.f32 1.0, %v5558_v17 }
 0x5ab   :  { %5571 = vrcp.f32 %v4097_v18 }
 0x5ac   :  { %5573 = vrcp.f32 %v4099_v19 }
 0x5af   :  { %v5560_v20 = vpop.eup %5559 }
 0x5b0   :  { %v5562_v21 = vpop.eup %5561  ;;  %v4117_v22 = vmin.f32 %v5560_v20, 1.0 }
 0x5b1   :  { %v5564_v23 = vpop.eup %5563  ;;  %v4119_v24 = vmin.f32 %v5562_v21, 1.0 }
 0x5b2   :  { %v5566_v25 = vpop.eup %5565  ;;  %v4118_v26 = vmin.f32 %v5564_v23, 1.0  ;;  %v4771_v27 = vpop.f32.mrb[20].mxu1 }
 0x5b3   :  { %v5568_v28 = vpop.eup %5567  ;;  %v4120_v29 = vmin.f32 %v5566_v25, 1.0  ;;  %v4772_v36 = vpop.f32.mrb[21].mxu1 }
 0x5b4   :  { %v5570_v37 = vpop.eup %5569  ;;  %v4703_v38 = vpack.c.bf16 %v4118_v26, %v4117_v22  ;;  %v4124_v39 = vmin.f32 %v5568_v28, 1.0  ;;  %v4773_v40 = vadd.f32 %v4772_v36, %v4771_v27  ;;  %v4774_v11 = vpop.f32.mrb[22].mxu1 }
 0x5b5   :  { %v5572_v46 = vpop.eup %5571  ;;  %v4704_v41 = vpack.c.bf16 %v4120_v29, %v4119_v24  ;;  %v4126_v42 = vmin.f32 %v5570_v37, 1.0  ;;  %v4775_v43 = vpop.f32.mrb[23].mxu1 }
 0x5b6   :  { %v5574_v44 = vpop.eup %5573  ;;  %4175 = vst [vmem:[#allocation13] sm:$0xff] %v4703_v38  ;;  %v4125_v49 = vmin.f32 %v5572_v46, 1.0  ;;  %v4776_v50 = vadd.f32 %v4775_v43, %v4774_v11 }
 0x5b7   :  { %4176 = vst [vmem:[#allocation13 + $0x8] sm:$0xff] %v4704_v41  ;;  %v4127_v51 = vmin.f32 %v5574_v44, 1.0 }
 0x5b8   :  { %v4707_v31 = vpack.c.bf16 %v4125_v49, %v4124_v39 }
 0x5b9   :  { %v4708_v52 = vpack.c.bf16 %v4127_v51, %v4126_v42 }
 0x5ba   :  { %4179 = vst [vmem:[#allocation13 + $0x1c] sm:$0xff] %v4707_v31 }
 0x5bb   :  { %4180 = vst [vmem:[#allocation13 + $0x24] sm:$0xff] %v4708_v52 }
 0x5bc   :  { %5742 = shalt.err (!%p5739_p10)
}
 0x5bd   :  { %s5743_s12 = scalar_lea.hbm %s6072_s11, 256 }
 0x5be   :  { %p5744_p11 = scmp.ne.s32.totalorder %s6072_s11, %s5743_s12  ;;  %p5747_p12 = scmp.lt.u32.totalorder %s5743_s12, %s6072_s11 }
 0x5c0   :  { %p5749_p13 = pnand %p5747_p12, %p5744_p11 }
 0x5c2   :  { %5752 = shalt.err (!%p5749_p13)
}
 0x5c3   :  { %4208 = dma.vmem_to_hbm [thread:$0]  %s4203_s29, 256, %s6072_s11, [#allocation15], %s5788_s27, %s5788_s27, %s5789_s28   ;;  %v2546_v53 = vsub.s32 6, %v5956_v30  ;;  %v2538_v10 = vsub.s32 4, %v5956_v30  ;;  %v2542_v48 = vsub.s32 5, %v5956_v30 }
 0x5c4   :  { %s5804_s11 = smov [#allocation13]  }
 0x5c5   :  { %v2547_v32 = vrot.slane %v6015_v33, %v2546_v53  ;;  %v2539_v12 = vrot.slane %v6015_v33, %v2538_v10  ;;  %v2543_v13 = vrot.slane %v6015_v33, %v2542_v48  ;;  %s4190_s27 = sshll.u32 %s5804_s11, 4  ;;  %s4191_s27 = int_to_ptr.vmem [resolvable:$true] %s4190_s27 }
 0x5c6   :  { %s5753_s28 = scalar_lea.vmem %s4191_s27, 896  ;;  %p5758_p1 = scmp.lt.s32.totalorder %s4191_s27, %s4191_s27 }
 0x5c7   :  { %v4000_v34 = vadd.f32 %v4773_v40, %v2547_v32  ;;  %v4003_v58 = vadd.f32 %v4776_v50, %v2547_v32  ;;  %p5754_p0 = scmp.ne.s32.totalorder %s4191_s27, %s5753_s28  ;;  %p5759_p2 = scmp.lt.s32.totalorder %s5753_s28, %s5753_s28 }
 0x5c9   :  { %p5760_p3 = por %p5759_p2, %p5758_p1 }
 0x5cb   :  { %p5761_p4 = pnand %p5760_p3, %p5754_p0 }
 0x5d2   :  { %v4793_v54 = vpop.f32.mrb[24].mxu1 }
 0x5d3   :  { %v4794_v55 = vpop.f32.mrb[25].mxu1 }
 0x5d4   :  { %v4795_v56 = vadd.f32 %v4794_v55, %v4793_v54  ;;  %v4796_v57 = vpop.f32.mrb[26].mxu1 }
 0x5d5   :  { %v4797_v35 = vpop.f32.mrb[27].mxu1 }
 0x5d6   :  { %v4041_v59 = vadd.f32 %v4795_v56, %v4000_v34  ;;  %v4798_v60 = vadd.f32 %v4797_v35, %v4796_v57 }
 0x5d8   :  { %v4053_v61 = vsub.f32 0.0, %v4041_v59  ;;  %v4044_v62 = vadd.f32 %v4798_v60, %v4003_v58 }
 0x5da   :  { %v4073_v63 = vmul.f32 1.442695, %v4053_v61  ;;  %v4060_v0 = vsub.f32 0.0, %v4044_v62 }
 0x5dc   :  { %5575 = vpow2.f32 %v4073_v63  ;;  %v4087_v1 = vmul.f32 1.442695, %v4060_v0 }
 0x5de   :  { %5577 = vpow2.f32 %v4087_v1 }
 0x5e6   :  { %v5576_v2 = vpop.eup %5575 }
 0x5e7   :  { %v4095_v3 = vadd.f32 1.0, %v5576_v2 }
 0x5e8   :  { %v5578_v4 = vpop.eup %5577 }
 0x5e9   :  { %5579 = vrcp.f32 %v4095_v3  ;;  %v4102_v5 = vadd.f32 1.0, %v5578_v4 }
 0x5eb   :  { %5581 = vrcp.f32 %v4102_v5 }
 0x5f3   :  { %v5580_v6 = vpop.eup %5579 }
 0x5f4   :  { %v4123_v7 = vmin.f32 %v5580_v6, 1.0 }
 0x5f5   :  { %v5582_v8 = vpop.eup %5581 }
 0x5f6   :  { %v4706_v47 = vpack.c.bf16 %v4123_v7, %v4123_v7  ;;  %v4130_v45 = vmin.f32 %v5582_v8, 1.0 }
 0x5f8   :  { %4178 = vst [vmem:[#allocation13 + $0x18] sm:$0xf] %v4706_v47  ;;  %v4710_v9 = vpack.c.bf16 %v4130_v45, %v4130_v45 }
 0x5fa   :  { %4182 = vst [vmem:[#allocation13 + $0x34] sm:$0xf] %v4710_v9 }
 0x611   :  { %v3956_v14 = vpop.f32.mrb[12].mxu0 }
 0x612   :  { %v4815_v15 = vadd.f32 %v3956_v14, %v2539_v12  ;;  %v3958_v16 = vpop.f32.mrb[13].mxu0 }
 0x613   :  { %v4816_v17 = vadd.f32 %v3958_v16, %v2543_v13  ;;  %v3960_v18 = vpop.f32.mrb[14].mxu0 }
 0x614   :  { %v4051_v19 = vsub.f32 0.0, %v4815_v15  ;;  %v4817_v20 = vadd.f32 %v3960_v18, %v2539_v12  ;;  %v3962_v21 = vpop.f32.mrb[15].mxu0 }
 0x615   :  { %v4052_v22 = vsub.f32 0.0, %v4816_v17  ;;  %v4818_v23 = vadd.f32 %v3962_v21, %v2543_v13 }
 0x616   :  { %v4069_v24 = vmul.f32 1.442695, %v4051_v19  ;;  %v4058_v25 = vsub.f32 0.0, %v4817_v20 }
 0x617   :  { %v4071_v26 = vmul.f32 1.442695, %v4052_v22  ;;  %v4059_v27 = vsub.f32 0.0, %v4818_v23 }
 0x618   :  { %5583 = vpow2.f32 %v4069_v24  ;;  %v4083_v30 = vmul.f32 1.442695, %v4058_v25 }
 0x619   :  { %5585 = vpow2.f32 %v4071_v26  ;;  %v4085_v28 = vmul.f32 1.442695, %v4059_v27 }
 0x61a   :  { %5587 = vpow2.f32 %v4083_v30 }
 0x61b   :  { %5589 = vpow2.f32 %v4085_v28 }
 0x622   :  { %v5584_v33 = vpop.eup %5583 }
 0x623   :  { %v5586_v29 = vpop.eup %5585  ;;  %v4093_v36 = vadd.f32 1.0, %v5584_v33 }
 0x624   :  { %v5588_v37 = vpop.eup %5587  ;;  %v4094_v38 = vadd.f32 1.0, %v5586_v29 }
 0x625   :  { %v5590_v39 = vpop.eup %5589  ;;  %5591 = vrcp.f32 %v4093_v36  ;;  %v4100_v40 = vadd.f32 1.0, %v5588_v37 }
 0x626   :  { %5593 = vrcp.f32 %v4094_v38  ;;  %v4101_v11 = vadd.f32 1.0, %v5590_v39 }
 0x627   :  { %5595 = vrcp.f32 %v4100_v40 }
 0x628   :  { %5597 = vrcp.f32 %v4101_v11 }
 0x62f   :  { %v5592_v46 = vpop.eup %5591 }
 0x630   :  { %v5594_v41 = vpop.eup %5593  ;;  %v4121_v42 = vmin.f32 %v5592_v46, 1.0 }
 0x631   :  { %v5596_v43 = vpop.eup %5595  ;;  %v4122_v44 = vmin.f32 %v5594_v41, 1.0 }
 0x632   :  { %v5598_v49 = vpop.eup %5597  ;;  %v4128_v50 = vmin.f32 %v5596_v43, 1.0 }
 0x633   :  { %v4705_v51 = vpack.c.bf16 %v4122_v44, %v4121_v42  ;;  %v4129_v31 = vmin.f32 %v5598_v49, 1.0 }
 0x635   :  { %4177 = vst [vmem:[#allocation13 + $0x10] sm:$0xff] %v4705_v51  ;;  %v4709_v52 = vpack.c.bf16 %v4129_v31, %v4128_v50 }
 0x637   :  { %4181 = vst [vmem:[#allocation13 + $0x2c] sm:$0xff] %v4709_v52 }
 0x638   :  { %5764 = shalt.err (!%p5761_p4)
}
 0x639   :  { %s5765_s6 = scalar_lea.hbm %s6071_s10, 896 }
 0x63a   :  { %p5766_p5 = scmp.ne.s32.totalorder %s6071_s10, %s5765_s6  ;;  %p5769_p6 = scmp.lt.u32.totalorder %s5765_s6, %s6071_s10 }
 0x63c   :  { %p5771_p7 = pnand %p5769_p6, %p5766_p5 }
 0x63e   :  { %5774 = shalt.err (!%p5771_p7)
}
 0x63f   :  { %4196 = dma.vmem_to_hbm [thread:$0]  %s4191_s27, 896, %s6071_s10, [#allocation4], %s5794_s4, %s5794_s4, %s5795_s13  }
 0x640   :  { %5783 = dma.done.wait [#allocation4], 896  }
 0x641   :  { %5784 = vsyncadd [#allocation4], 4294966400 }
 0x642   :  { %5785 = dma.done.wait [#allocation15], 256  }
 0x643   :  { %5786 = vsyncadd [#allocation15], 4294967040 }
 0x644   :  { %4215 = vsyncpa [#allocation3], 1 }
 0x645   :  { %4216 = vsyncpa [#allocation6], 1 }
 0x646   :  { %4217 = vsyncpa [#allocation9], 1 }
 0x647   :  { %4218 = vsyncpa [#allocation12], 1 }
 0x648   :  { %4219 = vsyncpa [#allocation4], 1 }
 0x649   :  { %4220 = vsyncpa [#allocation15], 1 }

</bundles_post_ra>
